<compile_context>
chip_gen: v6e
topology: v6e:2x2x1
jax: 0.10.0
libtpu: 0.0.40
codegen_flags: <defaults>
</compile_context>

<pallas_src>
import jax
import jax.numpy as jnp
import numpy as np
from jax.experimental import pallas as pl
from jax.experimental.pallas import tpu as pltpu

POOL_K = 5   # AvgPool2d kernel size
N_WIN = 4    # 2x2 pooled map -> 4 pool windows
C1 = 128     # conv1 output channels
C2 = 768     # conv2 output channels


def _round_up(v, m):
    return (v + m - 1) // m * m


def aux_tower_kernel(xw_ref, w1_ref, sh1_ref, w2_ref, sh2_ref, wl_ref, bl_ref,
                     out_ref):
    """AuxTower forward on one batch tile: 4 small + 2 big MXU matmuls.

    xw_ref : (4, TB, Kp)  per pool-window inputs, already ReLU'd, bf16
                          (row layout c*25 + dh*5 + dw, zero-padded to Kp)
    w1_ref : (Kp, 128)    shared avgpool+1x1conv+BN1-scale weight (bf16)
    sh1_ref: (1, 512)     BN1 shift tiled over the 4 windows (f32)
    w2_ref : (512, 768)   2x2 conv (+BN2 scale) as a matmul (bf16)
    sh2_ref: (1, 768)     BN2 shift (f32)
    wl_ref : (768, NP)    classifier weight, classes zero-padded (bf16)
    bl_ref : (1, NP)      classifier bias, zero-padded (f32)
    out_ref: (TB, NP)     logits (f32)
    """
    # ReLU->AvgPool(5)->Conv1x1->BN1-scale: one N=128 matmul per pool window
    # against the shared weight (~2.5x fewer MACs than the fully fused form).
    w1 = w1_ref[...]
    y1 = jnp.concatenate(
        [jnp.dot(xw_ref[k], w1, preferred_element_type=jnp.float32)
         for k in range(N_WIN)],
        axis=-1)                                                   # (TB, 512)
    y1 = jnp.maximum(y1 + sh1_ref[...], 0.0).astype(jnp.bfloat16)  # BN1 shift+ReLU
    # Conv2x2 (all 4 taps) + BN2-scale: one K=512, N=768 matmul.
    y2 = jnp.dot(y1, w2_ref[...], preferred_element_type=jnp.float32)
    y2 = jnp.maximum(y2 + sh2_ref[...], 0.0).astype(jnp.bfloat16)  # BN2 shift+ReLU
    # Classifier, lane-dense padded class dim.
    out_ref[...] = (jnp.dot(y2, wl_ref[...],
                            preferred_element_type=jnp.float32) + bl_ref[...])


def fuse_params(params, *, eps=1e-5):
    """Fold BN running stats and conv->matmul layouts ONCE per parameter set.

    Call this a single time (cache the result); the returned arrays are the
    VMEM-resident constants fed to aux_tower_forward. Keep the int fields
    static (don't jit this function directly).
    """
    C = params["w1"].shape[1]
    n_classes = params["wl"].shape[0]

    s1 = params["g1"] / jnp.sqrt(params["v1"] + eps)               # (128,)
    sh1 = params["be1"] - params["m1"] * s1
    s2 = params["g2"] / jnp.sqrt(params["v2"] + eps)               # (768,)
    sh2 = params["be2"] - params["m2"] * s2

    # Shared ReLU->avgpool->conv1x1->BN1-scale weight over one 5x5 window.
    # Rows ordered c*25 + dh*5 + dw to match the wrapper's NCHW window slices;
    # every spatial tap of a channel carries w1[:,c]*s1/25 (avg pool is linear).
    w1m = (params["w1"].reshape(C1, C).T * s1) / float(POOL_K * POOL_K)  # (C,128)
    K1 = C * POOL_K * POOL_K
    Kp = _round_up(K1, 128)                                         # lane-dense K
    w1f = jnp.pad(jnp.repeat(w1m, POOL_K * POOL_K, axis=0),
                  ((0, Kp - K1), (0, 0)))                           # (Kp, 128)
    sh1_t = jnp.tile(sh1, N_WIN).reshape(1, N_WIN * C1)             # (1, 512)

    # 2x2 conv as one (512, 768) matmul: rows = (kh*2+kw)*128 + cin, BN2 folded.
    w2f = jnp.transpose(params["w2"], (2, 3, 1, 0)).reshape(N_WIN * C1, C2) * s2
    sh2_r = sh2.reshape(1, C2)

    # Classifier padded to a lane-dense class dim (sliced back in the wrapper).
    NP = _round_up(n_classes, 128)
    wlT = jnp.pad(params["wl"].T, ((0, 0), (0, NP - n_classes)))     # (768, NP)
    blr = jnp.pad(params["bl"].reshape(1, -1), ((0, 0), (0, NP - n_classes)))

    return {
        "w1f": w1f.astype(jnp.bfloat16), "sh1": sh1_t.astype(jnp.float32),
        "w2f": w2f.astype(jnp.bfloat16), "sh2": sh2_r.astype(jnp.float32),
        "wl": wlT.astype(jnp.bfloat16), "bl": blr.astype(jnp.float32),
        "n_classes": n_classes, "ch_in": C, "Kp": Kp, "NP": NP,
    }


def aux_tower_forward(x, fused, *, stride=3):
    """x: (B, C, H, W) float32 (PyTorch NCHW). Returns (B, n_classes) f32."""
    B, C, H, W = x.shape
    assert C == fused["ch_in"]
    pooled_hw = (H - POOL_K) // stride + 1
    assert pooled_hw == 2, "AuxTower's Linear(768,.) requires a 2x2 pooled map"

    K1 = C * POOL_K * POOL_K
    Kp, NP, n_classes = fused["Kp"], fused["NP"], fused["n_classes"]

    # Batch tile: multiple of 16 (bf16 sublane packing). When B is large
    # enough, force >=2 grid steps so v7x's two TensorCores both get work.
    Bp = _round_up(B, 16)
    if B >= 32:
        TB = min(256, _round_up((Bp + 1) // 2, 16))
    else:
        TB = Bp
    Bp = _round_up(Bp, TB)

    # ReLU + gather the four 5x5 pool windows straight from NCHW slices
    # (no NCHW->NHWC transpose pass over x); window rows are c*25 + dh*5 + dw.
    xr = jnp.maximum(x, 0.0)
    wins = []
    for oh in range(2):
        for ow in range(2):
            h0, w0 = oh * stride, ow * stride
            wins.append(xr[:, :, h0:h0 + POOL_K, w0:w0 + POOL_K].reshape(B, K1))
    xw = jnp.stack(wins, axis=0)                                    # (4, B, K1)
    xw = jnp.pad(xw, ((0, 0), (0, Bp - B), (0, Kp - K1))).astype(jnp.bfloat16)

    # VMEM budget: x/out tiles double-buffered + 2-deep weights, with headroom;
    # clamp below v7x's 64 MiB physical per-core VMEM.
    vmem_est = (2 * N_WIN * TB * Kp * 2 + 2 * TB * NP * 4
                + 2 * 2 * (Kp * C1 + N_WIN * C1 * C2 + C2 * NP)
                + 2 * 4 * (N_WIN * C1 + C2 + NP))
    vmem_limit = int(min(max(2 * vmem_est, 32 << 20), 48 << 20))

    const2 = lambda i: (0, 0)   # weights: VMEM-resident across the grid
    out = pl.pallas_call(
        aux_tower_kernel,
        out_shape=jax.ShapeDtypeStruct((Bp, NP), jnp.float32),
        grid_spec=pltpu.PrefetchScalarGridSpec(
            num_scalar_prefetch=0,
            grid=(Bp // TB,),
            in_specs=[
                pl.BlockSpec((N_WIN, TB, Kp), lambda i: (0, i, 0)),  # x windows
                pl.BlockSpec((Kp, C1), const2),             # shared pool+conv1 w
                pl.BlockSpec((1, N_WIN * C1), const2),      # BN1 shift
                pl.BlockSpec((N_WIN * C1, C2), const2),     # conv2 (+BN2) w
                pl.BlockSpec((1, C2), const2),              # BN2 shift
                pl.BlockSpec((C2, NP), const2),             # classifier w
                pl.BlockSpec((1, NP), const2),              # classifier b
            ],
            out_specs=pl.BlockSpec((TB, NP), lambda i: (i, 0)),
        ),
        compiler_params=pltpu.CompilerParams(
            dimension_semantics=("parallel",),
            vmem_limit_bytes=vmem_limit),
    )(xw, fused["w1f"], fused["sh1"], fused["w2f"], fused["sh2"],
      fused["wl"], fused["bl"])
    return out[:B, :n_classes]


def aux_tower_reference(x, params, *, stride=3, eps=1e-5):
    """Pure-JAX f32 reference mirroring the PyTorch module (eval-mode BN)."""
    B, C, H, W = x.shape
    x = jnp.maximum(x, 0.0)
    n = (H - POOL_K) // stride + 1
    rows = []
    for oh in range(n):
        cols = []
        for ow in range(n):
            win = x[:, :, oh * stride:oh * stride + POOL_K,
                    ow * stride:ow * stride + POOL_K]
            cols.append(jnp.mean(win, axis=(2, 3)))
        rows.append(jnp.stack(cols, axis=-1))
    pooled = jnp.stack(rows, axis=-2)                               # (B,C,n,n)
    y1 = jnp.einsum("bchw,oc->bohw", pooled, params["w1"].reshape(C1, C))
    s1 = params["g1"] / jnp.sqrt(params["v1"] + eps)
    y1 = y1 * s1[None, :, None, None] + \
        (params["be1"] - params["m1"] * s1)[None, :, None, None]
    y1 = jnp.maximum(y1, 0.0)
    y2 = jnp.einsum("bchw,ochw->bo", y1, params["w2"])              # 2x2 valid conv
    s2 = params["g2"] / jnp.sqrt(params["v2"] + eps)
    y2 = y2 * s2 + (params["be2"] - params["m2"] * s2)
    y2 = jnp.maximum(y2, 0.0)
    return y2 @ params["wl"].T + params["bl"]


def init_params(key, ch_in, n_classes):
    ks = jax.random.split(key, 12)
    p = {}
    p["w1"] = jax.random.normal(ks[0], (C1, ch_in, 1, 1), jnp.float32) * 0.2
    p["g1"] = jax.random.uniform(ks[1], (C1,), jnp.float32, 0.5, 1.5)
    p["be1"] = jax.random.normal(ks[2], (C1,), jnp.float32) * 0.1
    p["m1"] = jax.random.normal(ks[3], (C1,), jnp.float32) * 0.1
    p["v1"] = jax.random.uniform(ks[4], (C1,), jnp.float32, 0.5, 1.5)
    p["w2"] = jax.random.normal(ks[5], (C2, C1, 2, 2), jnp.float32) * 0.05
    p["g2"] = jax.random.uniform(ks[6], (C2,), jnp.float32, 0.5, 1.5)
    p["be2"] = jax.random.normal(ks[7], (C2,), jnp.float32) * 0.1
    p["m2"] = jax.random.normal(ks[8], (C2,), jnp.float32) * 0.1
    p["v2"] = jax.random.uniform(ks[9], (C2,), jnp.float32, 0.5, 1.5)
    p["wl"] = jax.random.normal(ks[10], (n_classes, C2), jnp.float32) * 0.05
    p["bl"] = jax.random.normal(ks[11], (n_classes,), jnp.float32) * 0.1
    return p


if __name__ == "__main__":
    key = jax.random.PRNGKey(0)
    kx, kp = jax.random.split(key)
    # Small shapes consistent with the module: 8x8 input + stride=3 gives the
    # 2x2 pooled map the AuxTower head (Linear(768, .)) assumes.
    B, C, H, W = 2, 4, 8, 8
    n_classes = 10
    stride = 3

    x = jax.random.normal(kx, (B, C, H, W), jnp.float32)
    params = init_params(kp, C, n_classes)

    fused = fuse_params(params)            # one-time BN fold / weight reshaping
    out = aux_tower_forward(x, fused, stride=stride)
    out = jax.block_until_ready(out)
    assert out.shape == (B, n_classes)

    ref = aux_tower_reference(x, params, stride=stride)
    # bf16 MXU path vs f32 reference -> loose-but-structural tolerance.
    np.testing.assert_allclose(np.asarray(out), np.asarray(ref),
                               rtol=5e-2, atol=5e-2)
    print("KERNEL_OK")
</pallas_src>

<mosaic_0001>
module attributes {stable_mosaic.version = 11 : i64} {
  func.func @aux_tower_kernel(%arg0: i32, %arg1: memref<4x16x128xbf16, #tpu.memory_space<vmem>>, %arg2: memref<128x128xbf16, #tpu.memory_space<vmem>>, %arg3: memref<1x512xf32, #tpu.memory_space<vmem>>, %arg4: memref<512x768xbf16, #tpu.memory_space<vmem>>, %arg5: memref<1x768xf32, #tpu.memory_space<vmem>>, %arg6: memref<768x128xbf16, #tpu.memory_space<vmem>>, %arg7: memref<1x128xf32, #tpu.memory_space<vmem>>, %arg8: memref<16x128xf32, #tpu.memory_space<vmem>>) attributes {dimension_semantics = [#tpu.dimension_semantics<parallel>], iteration_bounds = array<i64: 1>, scalar_prefetch = 0 : i64, scratch_operands = 0 : i64, tpu.core_type = #tpu.core_type<tc>, window_params = [{transform_indices = @transform_0, window_bounds = array<i64: 4, 16, 128>}, {pipeline_mode = #tpu.pipeline_mode<synchronous>, transform_indices = @transform_1, window_bounds = array<i64: 128, 128>}, {pipeline_mode = #tpu.pipeline_mode<synchronous>, transform_indices = @transform_2, window_bounds = array<i64: 1, 512>}, {pipeline_mode = #tpu.pipeline_mode<synchronous>, transform_indices = @transform_3, window_bounds = array<i64: 512, 768>}, {pipeline_mode = #tpu.pipeline_mode<synchronous>, transform_indices = @transform_4, window_bounds = array<i64: 1, 768>}, {pipeline_mode = #tpu.pipeline_mode<synchronous>, transform_indices = @transform_5, window_bounds = array<i64: 768, 128>}, {pipeline_mode = #tpu.pipeline_mode<synchronous>, transform_indices = @transform_6, window_bounds = array<i64: 1, 128>}, {transform_indices = @transform_7, window_bounds = array<i64: 16, 128>}]} {
    %c0 = arith.constant 0 : index
    %c0_0 = arith.constant 0 : index
    %0 = vector.load %arg2[%c0, %c0_0] : memref<128x128xbf16, #tpu.memory_space<vmem>>, vector<128x128xbf16>
    %c0_1 = arith.constant 0 : index
    %c0_2 = arith.constant 0 : index
    %c0_3 = arith.constant 0 : index
    %1 = vector.load %arg1[%c0_1, %c0_2, %c0_3] : memref<4x16x128xbf16, #tpu.memory_space<vmem>>, vector<1x16x128xbf16>
    %2 = vector.shape_cast %1 : vector<1x16x128xbf16> to vector<16x128xbf16>
    %cst = arith.constant dense<0.000000e+00> : vector<16x128xf32>
    %3 = tpu.matmul %2, %0, %cst {dimension_numbers = #tpu.dot_dimension_numbers<[1], [0], [0], [1], [0, 0, 1, 1], [], []>} : vector<16x128xbf16>, vector<128x128xbf16>, vector<16x128xf32> -> vector<16x128xf32>
    %c1 = arith.constant 1 : index
    %c0_4 = arith.constant 0 : index
    %c0_5 = arith.constant 0 : index
    %4 = vector.load %arg1[%c1, %c0_4, %c0_5] : memref<4x16x128xbf16, #tpu.memory_space<vmem>>, vector<1x16x128xbf16>
    %5 = vector.shape_cast %4 : vector<1x16x128xbf16> to vector<16x128xbf16>
    %cst_6 = arith.constant dense<0.000000e+00> : vector<16x128xf32>
    %6 = tpu.matmul %5, %0, %cst_6 {dimension_numbers = #tpu.dot_dimension_numbers<[1], [0], [0], [1], [0, 0, 1, 1], [], []>} : vector<16x128xbf16>, vector<128x128xbf16>, vector<16x128xf32> -> vector<16x128xf32>
    %c2 = arith.constant 2 : index
    %c0_7 = arith.constant 0 : index
    %c0_8 = arith.constant 0 : index
    %7 = vector.load %arg1[%c2, %c0_7, %c0_8] : memref<4x16x128xbf16, #tpu.memory_space<vmem>>, vector<1x16x128xbf16>
    %8 = vector.shape_cast %7 : vector<1x16x128xbf16> to vector<16x128xbf16>
    %cst_9 = arith.constant dense<0.000000e+00> : vector<16x128xf32>
    %9 = tpu.matmul %8, %0, %cst_9 {dimension_numbers = #tpu.dot_dimension_numbers<[1], [0], [0], [1], [0, 0, 1, 1], [], []>} : vector<16x128xbf16>, vector<128x128xbf16>, vector<16x128xf32> -> vector<16x128xf32>
    %c3 = arith.constant 3 : index
    %c0_10 = arith.constant 0 : index
    %c0_11 = arith.constant 0 : index
    %10 = vector.load %arg1[%c3, %c0_10, %c0_11] : memref<4x16x128xbf16, #tpu.memory_space<vmem>>, vector<1x16x128xbf16>
    %11 = vector.shape_cast %10 : vector<1x16x128xbf16> to vector<16x128xbf16>
    %cst_12 = arith.constant dense<0.000000e+00> : vector<16x128xf32>
    %12 = tpu.matmul %11, %0, %cst_12 {dimension_numbers = #tpu.dot_dimension_numbers<[1], [0], [0], [1], [0, 0, 1, 1], [], []>} : vector<16x128xbf16>, vector<128x128xbf16>, vector<16x128xf32> -> vector<16x128xf32>
    %13 = tpu.concatenate %3, %6, %9, %12 in 1 : vector<16x128xf32>, vector<16x128xf32>, vector<16x128xf32>, vector<16x128xf32> -> vector<16x512xf32>
    %c0_13 = arith.constant 0 : index
    %c0_14 = arith.constant 0 : index
    %14 = vector.load %arg3[%c0_13, %c0_14] : memref<1x512xf32, #tpu.memory_space<vmem>>, vector<1x512xf32>
    %15 = vector.broadcast %14 : vector<1x512xf32> to vector<16x512xf32>
    %16 = arith.addf %13, %15 : vector<16x512xf32>
    %cst_15 = arith.constant 0.000000e+00 : f32
    %17 = vector.broadcast %cst_15 : f32 to vector<16x512xf32>
    %18 = arith.maximumf %16, %17 : vector<16x512xf32>
    %19 = arith.truncf %18 : vector<16x512xf32> to vector<16x512xbf16>
    %c0_16 = arith.constant 0 : index
    %c0_17 = arith.constant 0 : index
    %20 = vector.load %arg4[%c0_16, %c0_17] : memref<512x768xbf16, #tpu.memory_space<vmem>>, vector<512x768xbf16>
    %cst_18 = arith.constant dense<0.000000e+00> : vector<16x768xf32>
    %21 = tpu.matmul %19, %20, %cst_18 {dimension_numbers = #tpu.dot_dimension_numbers<[1], [0], [0], [1], [0, 0, 1, 1], [], []>} : vector<16x512xbf16>, vector<512x768xbf16>, vector<16x768xf32> -> vector<16x768xf32>
    %c0_19 = arith.constant 0 : index
    %c0_20 = arith.constant 0 : index
    %22 = vector.load %arg5[%c0_19, %c0_20] : memref<1x768xf32, #tpu.memory_space<vmem>>, vector<1x768xf32>
    %23 = vector.broadcast %22 : vector<1x768xf32> to vector<16x768xf32>
    %24 = arith.addf %21, %23 : vector<16x768xf32>
    %cst_21 = arith.constant 0.000000e+00 : f32
    %25 = vector.broadcast %cst_21 : f32 to vector<16x768xf32>
    %26 = arith.maximumf %24, %25 : vector<16x768xf32>
    %27 = arith.truncf %26 : vector<16x768xf32> to vector<16x768xbf16>
    %c0_22 = arith.constant 0 : index
    %c0_23 = arith.constant 0 : index
    %28 = vector.load %arg6[%c0_22, %c0_23] : memref<768x128xbf16, #tpu.memory_space<vmem>>, vector<768x128xbf16>
    %cst_24 = arith.constant dense<0.000000e+00> : vector<16x128xf32>
    %29 = tpu.matmul %27, %28, %cst_24 {dimension_numbers = #tpu.dot_dimension_numbers<[1], [0], [0], [1], [0, 0, 1, 1], [], []>} : vector<16x768xbf16>, vector<768x128xbf16>, vector<16x128xf32> -> vector<16x128xf32>
    %c0_25 = arith.constant 0 : index
    %c0_26 = arith.constant 0 : index
    %30 = vector.load %arg7[%c0_25, %c0_26] : memref<1x128xf32, #tpu.memory_space<vmem>>, vector<1x128xf32>
    %31 = vector.broadcast %30 : vector<1x128xf32> to vector<16x128xf32>
    %32 = arith.addf %29, %31 : vector<16x128xf32>
    %c0_27 = arith.constant 0 : index
    %c0_28 = arith.constant 0 : index
    %33 = vector.load %arg8[%c0_27, %c0_28] : memref<16x128xf32, #tpu.memory_space<vmem>>, vector<16x128xf32>
    tpu.vector_store %arg8[%c0_27, %c0_28], %32 {strides = array<i32>} : memref<16x128xf32, #tpu.memory_space<vmem>>, vector<16x128xf32>,
    return
  }
  func.func @transform_0(%arg0: i32) -> (i32, i32, i32) {
    %c0_i32 = arith.constant 0 : i32
    %c0_i32_0 = arith.constant 0 : i32
    %c0_i32_1 = arith.constant 0 : i32
    return %c0_i32, %arg0, %c0_i32_0 : i32, i32, i32
  }
  func.func @transform_1(%arg0: i32) -> (i32, i32) {
    %c0_i32 = arith.constant 0 : i32
    %c0_i32_0 = arith.constant 0 : i32
    %c0_i32_1 = arith.constant 0 : i32
    return %c0_i32, %c0_i32_0 : i32, i32
  }
  func.func @transform_2(%arg0: i32) -> (i32, i32) {
    %c0_i32 = arith.constant 0 : i32
    %c0_i32_0 = arith.constant 0 : i32
    %c0_i32_1 = arith.constant 0 : i32
    return %c0_i32, %c0_i32_0 : i32, i32
  }
  func.func @transform_3(%arg0: i32) -> (i32, i32) {
    %c0_i32 = arith.constant 0 : i32
    %c0_i32_0 = arith.constant 0 : i32
    %c0_i32_1 = arith.constant 0 : i32
    return %c0_i32, %c0_i32_0 : i32, i32
  }
  func.func @transform_4(%arg0: i32) -> (i32, i32) {
    %c0_i32 = arith.constant 0 : i32
    %c0_i32_0 = arith.constant 0 : i32
    %c0_i32_1 = arith.constant 0 : i32
    return %c0_i32, %c0_i32_0 : i32, i32
  }
  func.func @transform_5(%arg0: i32) -> (i32, i32) {
    %c0_i32 = arith.constant 0 : i32
    %c0_i32_0 = arith.constant 0 : i32
    %c0_i32_1 = arith.constant 0 : i32
    return %c0_i32, %c0_i32_0 : i32, i32
  }
  func.func @transform_6(%arg0: i32) -> (i32, i32) {
    %c0_i32 = arith.constant 0 : i32
    %c0_i32_0 = arith.constant 0 : i32
    %c0_i32_1 = arith.constant 0 : i32
    return %c0_i32, %c0_i32_0 : i32, i32
  }
  func.func @transform_7(%arg0: i32) -> (i32, i32) {
    %c0_i32 = arith.constant 0 : i32
    %c0_i32_0 = arith.constant 0 : i32
    return %arg0, %c0_i32 : i32, i32
  }
}

</mosaic_0001>

<bundles_post_ra>
// kernel: tpu_custom_call.1
= control target key start
LH: loop header
LB: loop body
LE: loop exit
PB: predicated region body
PF: predicated region fallthrough
CT: control target
= control target key end

     0   :  { %12 = vsyncpa [#allocation3], 0  ;;  %s3498_s0 = inlined_call_operand.hbm [shape: bf16[4,16,128], index: 0, kind: input, shape index: {}]   ;;  %s3499_s1 = inlined_call_operand.hbm [shape: bf16[128,128], index: 1, kind: input, shape index: {}]   ;;  %s3500_s2 = inlined_call_operand.hbm [shape: f32[1,512], index: 2, kind: input, shape index: {}]   ;;  %s3501_s3 = inlined_call_operand.hbm [shape: bf16[512,768], index: 3, kind: input, shape index: {}]   ;;  %s3502_s4 = inlined_call_operand.vmem [shape: f32[1,768], index: 4, kind: input, shape index: {}]   ;;  %s3503_s5 = inlined_call_operand.hbm [shape: bf16[768,128], index: 5, kind: input, shape index: {}]   ;;  %s3504_s6 = inlined_call_operand.vmem [shape: f32[1,128], index: 6, kind: input, shape index: {}]   ;;  %s3505_s7 = inlined_call_operand.hbm [shape: f32[16,128], index: 7, kind: output, shape index: {}]  }
   0x1   :  { %13 = vsyncpa [#allocation6], 0 }
   0x2   :  { %14 = vsyncpa [#allocation9], 0 }
   0x3   :  { %15 = vsyncpa [#allocation4], 0  ;;  %s3319_s24 = smov [#allocation5]   ;;  %s3320_s26 = smov [#allocation8]  }
   0x4   :  { %s33_s25 = sshll.u32 %s3319_s24, 4  ;;  %s55_s27 = sshll.u32 %s3320_s26, 4  ;;  %s34_s25 = int_to_ptr.vmem [resolvable:$true] %s33_s25  ;;  %s56_s27 = int_to_ptr.vmem [resolvable:$true] %s55_s27 }
   0x5   :  { %s3199_s28 = scalar_lea.vmem %s34_s25, 1024  ;;  %p3204_p1 = scmp.lt.s32.totalorder %s34_s25, %s34_s25 }
   0x6   :  { %p3200_p0 = scmp.ne.s32.totalorder %s34_s25, %s3199_s28  ;;  %p3205_p2 = scmp.lt.s32.totalorder %s3199_s28, %s3199_s28 }
   0x8   :  { %p3206_p3 = por %p3205_p2, %p3204_p1 }
   0xa   :  { %p3207_p4 = pnand %p3206_p3, %p3200_p0 }
   0xc   :  { %3210 = shalt.err (!%p3207_p4)
}
   0xd   :  { %s3321_s29 = smov 64   ;;  %s3322_s30 = smov 4  }
   0xe   :  { %39 = dma.hbm_to_vmem [thread:$0]  %s3499_s1, 1024, %s34_s25, [#allocation6], %s3321_s29, %s3321_s29, %s3322_s30  }
   0xf   :  { %s3219_s10 = scalar_lea.vmem %s56_s27, 24576  ;;  %p3224_p6 = scmp.lt.s32.totalorder %s56_s27, %s56_s27 }
  0x10   :  { %p3220_p5 = scmp.ne.s32.totalorder %s56_s27, %s3219_s10  ;;  %p3225_p7 = scmp.lt.s32.totalorder %s3219_s10, %s3219_s10 }
  0x12   :  { %p3226_p8 = por %p3225_p7, %p3224_p6 }
  0x14   :  { %p3227_p9 = pnand %p3226_p8, %p3220_p5 }
  0x16   :  { %3230 = shalt.err (!%p3227_p9)
}
  0x17   :  { %s3323_s11 = smov 384   ;;  %s3324_s12 = smov 24  }
  0x18   :  { %61 = dma.hbm_to_vmem [thread:$0]  %s3501_s3, 24576, %s56_s27, [#allocation9], %s3323_s11, %s3323_s11, %s3324_s12  }
  0x19   :  { %s3325_s15 = smov [#allocation2]   ;;  %s3326_s17 = smov [#allocation7]  }
  0x1a   :  { %s21_s16 = sshll.u32 %s3325_s15, 4  ;;  %s46_s18 = sshll.u32 %s3326_s17, 4  ;;  %s22_s16 = int_to_ptr.vmem [resolvable:$true] %s21_s16  ;;  %s47_s18 = int_to_ptr.vmem [resolvable:$true] %s46_s18 }
  0x1b   :  { %s3239_s1 = scalar_lea.vmem %s22_s16, 512  ;;  %p3244_p11 = scmp.lt.s32.totalorder %s22_s16, %s22_s16 }
  0x1c   :  { %p3240_p10 = scmp.ne.s32.totalorder %s22_s16, %s3239_s1  ;;  %p3245_p12 = scmp.lt.s32.totalorder %s3239_s1, %s3239_s1 }
  0x1e   :  { %p3246_p13 = por %p3245_p12, %p3244_p11 }
  0x20   :  { %p3247_p0 = pnand %p3246_p13, %p3240_p10 }
  0x22   :  { %3250 = shalt.err (!%p3247_p0)
}
  0x23   :  { %27 = dma.hbm_to_vmem [thread:$0]  %s3498_s0, 512, %s22_s16, [#allocation3], %s3321_s29, %s3321_s29, %s3322_s30  }
  0x24   :  { %s3259_s3 = scalar_lea.vmem %s47_s18, 64  ;;  %p3264_p2 = scmp.lt.s32.totalorder %s47_s18, %s47_s18 }
  0x25   :  { %p3260_p1 = scmp.ne.s32.totalorder %s47_s18, %s3259_s3  ;;  %p3265_p3 = scmp.lt.s32.totalorder %s3259_s3, %s3259_s3 }
  0x27   :  { %p3266_p4 = por %p3265_p3, %p3264_p2 }
  0x29   :  { %p3267_p5 = pnand %p3266_p4, %p3260_p1 }
  0x2b   :  { %3270 = shalt.err (!%p3267_p5)
}
  0x2c   :  { %49 = dma.hbm_to_vmem [thread:$0]  %s3500_s2, 64, %s47_s18, [#allocation6]  }
  0x2d   :  { %s3327_s23 = smov [#allocation10]  }
  0x2e   :  { %s69_s24 = sshll.u32 %s3327_s23, 4  ;;  %s70_s24 = int_to_ptr.vmem [resolvable:$true] %s69_s24 }
  0x2f   :  { %s3279_s25 = scalar_lea.vmem %s70_s24, 6144  ;;  %p3284_p7 = scmp.lt.s32.totalorder %s70_s24, %s70_s24 }
  0x30   :  { %p3280_p6 = scmp.ne.s32.totalorder %s70_s24, %s3279_s25  ;;  %p3285_p8 = scmp.lt.s32.totalorder %s3279_s25, %s3279_s25 }
  0x32   :  { %p3286_p9 = por %p3285_p8, %p3284_p7 }
  0x34   :  { %p3287_p10 = pnand %p3286_p9, %p3280_p6 }
  0x36   :  { %3290 = shalt.err (!%p3287_p10)
}
  0x37   :  { %75 = dma.hbm_to_vmem [thread:$0]  %s3503_s5, 6144, %s70_s24, [#allocation9], %s3321_s29, %s3321_s29, %s3322_s30  }
  0x38   :  { %3311 = dma.done.wait [#allocation3], 512  }
  0x39   :  { %3312 = vsyncadd [#allocation3], 4294966784 }
  0x3a   :  { %3313 = dma.done.wait [#allocation6], 1088  }
  0x3b   :  { %3314 = vsyncadd [#allocation6], 4294966208 }
  0x3c   :  { %3315 = dma.done.wait [#allocation9], 30720  }
  0x3d   :  { %3316 = vsyncadd [#allocation9], 4294936576  ;;  %v3328_v0 = vmov 0.0   ;;  %vm3329_vm0 = vmmov 0   ;;  %v2843_v1 = vld [vmem:[#allocation5 + $0x38] sm:$0xff]   ;;  %v2844_v2 = vld [vmem:[#allocation5 + $0x30] sm:$0xff]  }
  0x3e   :  { %2749 = vmatprep.subr.bf16.mxu0 %v3328_v0  ;;  %2769 = vmatprep.subr.bf16.mxu1 %v3328_v0  ;;  %v2845_v3 = vld [vmem:[#allocation5 + $0x28] sm:$0xff]   ;;  %v2846_v4 = vld [vmem:[#allocation5 + $0x20] sm:$0xff]   ;;  %v2847_v5 = vld [vmem:[#allocation5 + $0x18] sm:$0xff]   ;;  %s3330_s28 = smov [#allocation11]  }
  0x3f   :  { %2765 = vmatprep.mubr.msk.bf16.mxu0 %vm3329_vm0, %v3328_v0  ;;  %2785 = vmatprep.mubr.msk.bf16.mxu1 %vm3329_vm0, %v3328_v0  ;;  %v2848_v6 = vld [vmem:[#allocation5 + $0x10] sm:$0xff]   ;;  %v2849_v7 = vld [vmem:[#allocation5 + $0x8] sm:$0xff]   ;;  %v2850_v8 = vld [vmem:[#allocation5] sm:$0xff]   ;;  %s2380_s29 = sshll.u32 %s3330_s28, 4  ;;  %s2381_s29 = int_to_ptr.vmem [resolvable:$true] %s2380_s29 }
  0x40   :  { %2750 = vmatpush3.bf16.msra.mxu0 %v2843_v1  ;;  %2770 = vmatpush3.bf16.msra.mxu1 %v2843_v1  ;;  %v2851_v9 = vld [vmem:[#allocation2] sm:$0xff]   ;;  %v2852_v10 = vld [vmem:[#allocation2 + $0x8] sm:$0xff]   ;;  %v2857_v11 = vld [vmem:[#allocation8 + $0x154] ss:$24 sps:$4 sm:$0xff]   ;;  %p3296_p12 = scmp.lt.s32.totalorder %s2381_s29, %s2381_s29 }
  0x41   :  { %2751 = vmatprep.subr.bf16.mxu0 %v3328_v0  ;;  %2771 = vmatprep.subr.bf16.mxu1 %v3328_v0  ;;  %v2884_v12 = vld [vmem:[#allocation8 + $0x454] ss:$24 sps:$4 sm:$0xff]   ;;  %v2855_v15 = vld [vmem:[#allocation8 + $0x150] ss:$24 sps:$4 sm:$0xff]   ;;  %v2860_v17 = vld [vmem:[#allocation8 + $0x124] ss:$24 sps:$4 sm:$0xff]  }
  0x42   :  { %v2853_v13 = vld [vmem:[#allocation2 + $0x10] sm:$0xff]   ;;  %v2854_v14 = vld [vmem:[#allocation2 + $0x18] sm:$0xff]   ;;  %v2890_v18 = vld [vmem:[#allocation8 + $0x424] ss:$24 sps:$4 sm:$0xff]  }
  0x43   :  { %v2882_v16 = vld [vmem:[#allocation8 + $0x450] ss:$24 sps:$4 sm:$0xff]   ;;  %v2858_v19 = vld [vmem:[#allocation8 + $0x120] ss:$24 sps:$4 sm:$0xff]   ;;  %v2863_v21 = vld [vmem:[#allocation8 + $0xf4] ss:$24 sps:$4 sm:$0xff]  }
  0x44   :  { %2752 = vmatpush3.bf16.msra.mxu0 %v2844_v2  ;;  %2772 = vmatpush3.bf16.msra.mxu1 %v2844_v2  ;;  %v2888_v20 = vld [vmem:[#allocation8 + $0x420] ss:$24 sps:$4 sm:$0xff]   ;;  %v2896_v22 = vld [vmem:[#allocation8 + $0x3f4] ss:$24 sps:$4 sm:$0xff]   ;;  %v2861_v23 = vld [vmem:[#allocation8 + $0xf0] ss:$24 sps:$4 sm:$0xff]  }
  0x45   :  { %2753 = vmatprep.subr.bf16.mxu0 %v3328_v0  ;;  %2773 = vmatprep.subr.bf16.mxu1 %v3328_v0  ;;  %v2894_v24 = vld [vmem:[#allocation8 + $0x3f0] ss:$24 sps:$4 sm:$0xff]   ;;  %v2866_v25 = vld [vmem:[#allocation8 + $0xc4] ss:$24 sps:$4 sm:$0xff]   ;;  %v2864_v27 = vld [vmem:[#allocation8 + $0xc0] ss:$24 sps:$4 sm:$0xff]  }
  0x46   :  { %v2902_v26 = vld [vmem:[#allocation8 + $0x3c4] ss:$24 sps:$4 sm:$0xff]   ;;  %v2900_v28 = vld [vmem:[#allocation8 + $0x3c0] ss:$24 sps:$4 sm:$0xff]   ;;  %v2869_v29 = vld [vmem:[#allocation8 + $0x94] ss:$24 sps:$4 sm:$0xff]  }
  0x47   :  { %v2908_v30 = vld [vmem:[#allocation8 + $0x394] ss:$24 sps:$4 sm:$0xff]   ;;  %v2867_v31 = vld [vmem:[#allocation8 + $0x90] ss:$24 sps:$4 sm:$0xff]   ;;  %v2872_v33 = vld [vmem:[#allocation8 + $0x64] ss:$24 sps:$4 sm:$0xff]  }
  0x48   :  { %2754 = vmatpush3.bf16.msra.mxu0 %v2845_v3  ;;  %2774 = vmatpush3.bf16.msra.mxu1 %v2845_v3  ;;  %v2906_v32 = vld [vmem:[#allocation8 + $0x390] ss:$24 sps:$4 sm:$0xff]   ;;  %v2914_v34 = vld [vmem:[#allocation8 + $0x364] ss:$24 sps:$4 sm:$0xff]   ;;  %v2870_v35 = vld [vmem:[#allocation8 + $0x60] ss:$24 sps:$4 sm:$0xff]  }
  0x49   :  { %2755 = vmatprep.subr.bf16.mxu0 %v3328_v0  ;;  %2775 = vmatprep.subr.bf16.mxu1 %v3328_v0  ;;  %v2912_v36 = vld [vmem:[#allocation8 + $0x360] ss:$24 sps:$4 sm:$0xff]   ;;  %v2875_v37 = vld [vmem:[#allocation8 + $0x34] ss:$24 sps:$4 sm:$0xff]   ;;  %v2873_v38 = vld [vmem:[#allocation8 + $0x30] ss:$24 sps:$4 sm:$0xff]  }
  0x4a   :  { %v2878_v39 = vld [vmem:[#allocation8 + $0x4] ss:$24 sps:$4 sm:$0xff]   ;;  %v2876_v40 = vld [vmem:[#allocation8] ss:$24 sps:$4 sm:$0xff]   ;;  %v2881_v41 = vld [vmem:[#allocation8 + $0x2d4] ss:$24 sps:$4 sm:$0xff]  }
  0x4b   :  { %v2879_v42 = vld [vmem:[#allocation8 + $0x2d0] ss:$24 sps:$4 sm:$0xff]   ;;  %v2887_v43 = vld [vmem:[#allocation8 + $0x2a4] ss:$24 sps:$4 sm:$0xff]   ;;  %v2885_v44 = vld [vmem:[#allocation8 + $0x2a0] ss:$24 sps:$4 sm:$0xff]  }
  0x4c   :  { %2756 = vmatpush3.bf16.msra.mxu0 %v2846_v4  ;;  %2776 = vmatpush3.bf16.msra.mxu1 %v2846_v4  ;;  %v2920_v45 = vld [vmem:[#allocation8 + $0x334] ss:$24 sps:$4 sm:$0xff]   ;;  %v2918_v47 = vld [vmem:[#allocation8 + $0x330] ss:$24 sps:$4 sm:$0xff]   ;;  %v2926_v49 = vld [vmem:[#allocation8 + $0x304] ss:$24 sps:$4 sm:$0xff]  }
  0x4d   :  { %2757 = vmatprep.subr.bf16.mxu0 %v3328_v0  ;;  %2777 = vmatprep.subr.bf16.mxu1 %v3328_v0  ;;  %v2893_v46 = vld [vmem:[#allocation8 + $0x274] ss:$24 sps:$4 sm:$0xff]   ;;  %v2891_v48 = vld [vmem:[#allocation8 + $0x270] ss:$24 sps:$4 sm:$0xff]   ;;  %v2899_v50 = vld [vmem:[#allocation8 + $0x244] ss:$24 sps:$4 sm:$0xff]  }
  0x4e   :  { %v2924_v51 = vld [vmem:[#allocation8 + $0x300] ss:$24 sps:$4 sm:$0xff]   ;;  %v2929_v53 = vld [vmem:[#allocation8 + $0x5d4] ss:$24 sps:$4 sm:$0xff]   ;;  %v2927_v55 = vld [vmem:[#allocation8 + $0x5d0] ss:$24 sps:$4 sm:$0xff]  }
  0x4f   :  { %v2897_v52 = vld [vmem:[#allocation8 + $0x240] ss:$24 sps:$4 sm:$0xff]   ;;  %v2905_v54 = vld [vmem:[#allocation8 + $0x214] ss:$24 sps:$4 sm:$0xff]   ;;  %v2903_v56 = vld [vmem:[#allocation8 + $0x210] ss:$24 sps:$4 sm:$0xff]  }
  0x50   :  { %2758 = vmatpush3.bf16.msra.mxu0 %v2847_v5  ;;  %2778 = vmatpush3.bf16.msra.mxu1 %v2847_v5  ;;  %v2933_v57 = vld [vmem:[#allocation8 + $0x5a0] ss:$24 sps:$4 sm:$0xff]   ;;  %v2935_v58 = vld [vmem:[#allocation8 + $0x5a4] ss:$24 sps:$4 sm:$0xff]   ;;  %v2939_v61 = vld [vmem:[#allocation8 + $0x570] ss:$24 sps:$4 sm:$0xff]  }
  0x51   :  { %2759 = vmatprep.subr.bf16.mxu0 %v3328_v0  ;;  %2779 = vmatprep.subr.bf16.mxu1 %v3328_v0  ;;  %v2911_v59 = vld [vmem:[#allocation8 + $0x1e4] ss:$24 sps:$4 sm:$0xff]   ;;  %v2909_v60 = vld [vmem:[#allocation8 + $0x1e0] ss:$24 sps:$4 sm:$0xff]   ;;  %v2941_v62 = vld [vmem:[#allocation8 + $0x574] ss:$24 sps:$4 sm:$0xff]  }
  0x52   :  { %v2917_v63 = vld [vmem:[#allocation8 + $0x1b4] ss:$24 sps:$4 sm:$0xff]  }
  0x54   :  { %2760 = vmatpush3.bf16.msra.mxu0 %v2848_v6  ;;  %2780 = vmatpush3.bf16.msra.mxu1 %v2848_v6 }
  0x55   :  { %2761 = vmatprep.subr.bf16.mxu0 %v3328_v0  ;;  %2781 = vmatprep.subr.bf16.mxu1 %v3328_v0 }
  0x58   :  { %2762 = vmatpush3.bf16.msra.mxu0 %v2849_v7  ;;  %2782 = vmatpush3.bf16.msra.mxu1 %v2849_v7 }
  0x59   :  { %2763 = vmatprep.subr.bf16.mxu0 %v3328_v0  ;;  %2783 = vmatprep.subr.bf16.mxu1 %v3328_v0 }
  0x5c   :  { %2764 = vmatpush3.bf16.msra.mxu0 %v2850_v8  ;;  %2784 = vmatpush3.bf16.msra.mxu1 %v2850_v8 }
  0x5d   :  { %2789 = vmatprep.subr.bf16.mxu0 %v3328_v0  ;;  %2809 = vmatprep.subr.bf16.mxu1 %v3328_v0 }
  0x5f   :  { %2766 = vmatmul.mubr.bf16.vlgmr.msra.gmra.mxu0 %v2851_v9  ;;  %2786 = vmatmul.mubr.bf16.vlgmr.msra.gmra.mxu1 %v2852_v10  ;;  %v2959_v9 = vld [vmem:[#allocation8 + $0x4e4] ss:$24 sps:$4 sm:$0xff]   ;;  %v2965_v10 = vld [vmem:[#allocation8 + $0x4b4] ss:$24 sps:$4 sm:$0xff]  }
  0x60   :  { %2790 = vmatpush3.bf16.msra.mxu0 %v2843_v1  ;;  %2810 = vmatpush3.bf16.msra.mxu1 %v2843_v1  ;;  %v2945_v1 = vld [vmem:[#allocation8 + $0x540] ss:$24 sps:$4 sm:$0xff]  }
  0x61   :  { %2791 = vmatprep.subr.bf16.mxu0 %v3328_v0  ;;  %2811 = vmatprep.subr.bf16.mxu1 %v3328_v0 }
  0x62   :  { %2805 = vmatprep.mubr.msk.bf16.mxu0 %vm3329_vm0, %v3328_v0  ;;  %2825 = vmatprep.mubr.msk.bf16.mxu1 %vm3329_vm0, %v3328_v0 }
  0x64   :  { %2792 = vmatpush3.bf16.msra.mxu0 %v2844_v2  ;;  %2812 = vmatpush3.bf16.msra.mxu1 %v2844_v2  ;;  %v2947_v2 = vld [vmem:[#allocation8 + $0x544] ss:$24 sps:$4 sm:$0xff]  }
  0x65   :  { %2793 = vmatprep.subr.bf16.mxu0 %v3328_v0  ;;  %2813 = vmatprep.subr.bf16.mxu1 %v3328_v0 }
  0x68   :  { %2794 = vmatpush3.bf16.msra.mxu0 %v2845_v3  ;;  %2814 = vmatpush3.bf16.msra.mxu1 %v2845_v3  ;;  %v2923_v3 = vld [vmem:[#allocation8 + $0x184] ss:$24 sps:$4 sm:$0xff]  }
  0x69   :  { %2795 = vmatprep.subr.bf16.mxu0 %v3328_v0  ;;  %2815 = vmatprep.subr.bf16.mxu1 %v3328_v0 }
  0x6c   :  { %2796 = vmatpush3.bf16.msra.mxu0 %v2846_v4  ;;  %2816 = vmatpush3.bf16.msra.mxu1 %v2846_v4  ;;  %v2921_v4 = vld [vmem:[#allocation8 + $0x180] ss:$24 sps:$4 sm:$0xff]  }
  0x6d   :  { %2797 = vmatprep.subr.bf16.mxu0 %v3328_v0  ;;  %2817 = vmatprep.subr.bf16.mxu1 %v3328_v0 }
  0x70   :  { %2798 = vmatpush3.bf16.msra.mxu0 %v2847_v5  ;;  %2818 = vmatpush3.bf16.msra.mxu1 %v2847_v5  ;;  %v2951_v5 = vld [vmem:[#allocation8 + $0x510] ss:$24 sps:$4 sm:$0xff]  }
  0x71   :  { %2799 = vmatprep.subr.bf16.mxu0 %v3328_v0  ;;  %2819 = vmatprep.subr.bf16.mxu1 %v3328_v0 }
  0x74   :  { %2800 = vmatpush3.bf16.msra.mxu0 %v2848_v6  ;;  %2820 = vmatpush3.bf16.msra.mxu1 %v2848_v6  ;;  %v2953_v6 = vld [vmem:[#allocation8 + $0x514] ss:$24 sps:$4 sm:$0xff]  }
  0x75   :  { %2801 = vmatprep.subr.bf16.mxu0 %v3328_v0  ;;  %2821 = vmatprep.subr.bf16.mxu1 %v3328_v0 }
  0x78   :  { %2802 = vmatpush3.bf16.msra.mxu0 %v2849_v7  ;;  %2822 = vmatpush3.bf16.msra.mxu1 %v2849_v7  ;;  %v2932_v7 = vld [vmem:[#allocation8 + $0x15c] ss:$24 sps:$4 sm:$0xff]  }
  0x79   :  { %2803 = vmatprep.subr.bf16.mxu0 %v3328_v0  ;;  %2823 = vmatprep.subr.bf16.mxu1 %v3328_v0  ;;  %v2915_v0 = vld [vmem:[#allocation8 + $0x1b0] ss:$24 sps:$4 sm:$0xff]  }
  0x7c   :  { %2804 = vmatpush3.bf16.msra.mxu0 %v2850_v8  ;;  %2824 = vmatpush3.bf16.msra.mxu1 %v2850_v8  ;;  %v2957_v8 = vld [vmem:[#allocation8 + $0x4e0] ss:$24 sps:$4 sm:$0xff]  }
  0x7d   :  { %1583 = vmatprep.subr.bf16.mxu0 %v2857_v11  ;;  %1626 = vmatprep.subr.bf16.mxu1 %v2884_v12  ;;  %v2963_v11 = vld [vmem:[#allocation8 + $0x4b0] ss:$24 sps:$4 sm:$0xff]   ;;  %v2971_v12 = vld [vmem:[#allocation8 + $0x484] ss:$24 sps:$4 sm:$0xff]  }
  0x7f   :  { %2806 = vmatmul.mubr.bf16.vlgmr.msra.gmra.mxu0 %v2853_v13  ;;  %2826 = vmatmul.mubr.bf16.vlgmr.msra.gmra.mxu1 %v2854_v14  ;;  %v2969_v13 = vld [vmem:[#allocation8 + $0x480] ss:$24 sps:$4 sm:$0xff]   ;;  %v2980_v14 = vld [vmem:[#allocation8 + $0x45c] ss:$24 sps:$4 sm:$0xff]  }
  0x80   :  { %1584 = vmatpush1.bf16.msra.mxu0 %v2855_v15  ;;  %1627 = vmatpush1.bf16.msra.mxu1 %v2882_v16  ;;  %v359_v15 = vlaneseq }
  0x81   :  { %1585 = vmatprep.subr.bf16.mxu0 %v2860_v17  ;;  %1628 = vmatprep.subr.bf16.mxu1 %v2890_v18 }
  0x82   :  { %v3437_v16 = vshrl.u32 %v359_v15, 7  ;;  %v2978_v15 = vld [vmem:[#allocation8 + $0x458] ss:$24 sps:$4 sm:$0xff]  }
  0x84   :  { %1586 = vmatpush1.bf16.msra.mxu0 %v2858_v19  ;;  %1629 = vmatpush1.bf16.msra.mxu1 %v2888_v20  ;;  %v361_v17 = vsub.s32 0, %v3437_v16  ;;  %v365_v18 = vsub.s32 1, %v3437_v16  ;;  %v357_v19 = vld [vmem:[#allocation7] sm:$0xf] }
  0x85   :  { %1587 = vmatprep.subr.bf16.mxu0 %v2863_v21  ;;  %1630 = vmatprep.subr.bf16.mxu1 %v2896_v22 }
  0x86   :  { %v362_v20 = vrot.slane %v357_v19, %v361_v17  ;;  %v366_v21 = vrot.slane %v357_v19, %v365_v18 }
  0x88   :  { %1588 = vmatpush1.bf16.msra.mxu0 %v2861_v23  ;;  %1631 = vmatpush1.bf16.msra.mxu1 %v2894_v24 }
  0x89   :  { %1589 = vmatprep.subr.bf16.mxu0 %v2866_v25  ;;  %1632 = vmatprep.subr.bf16.mxu1 %v2902_v26 }
  0x8c   :  { %1590 = vmatpush1.bf16.msra.mxu0 %v2864_v27  ;;  %1633 = vmatpush1.bf16.msra.mxu1 %v2900_v28 }
  0x8d   :  { %1591 = vmatprep.subr.bf16.mxu0 %v2869_v29  ;;  %1634 = vmatprep.subr.bf16.mxu1 %v2908_v30 }
  0x90   :  { %1592 = vmatpush1.bf16.msra.mxu0 %v2867_v31  ;;  %1635 = vmatpush1.bf16.msra.mxu1 %v2906_v32 }
  0x91   :  { %1593 = vmatprep.subr.bf16.mxu0 %v2872_v33  ;;  %1636 = vmatprep.subr.bf16.mxu1 %v2914_v34 }
  0x94   :  { %1594 = vmatpush1.bf16.msra.mxu0 %v2870_v35  ;;  %1637 = vmatpush1.bf16.msra.mxu1 %v2912_v36 }
  0x95   :  { %1595 = vmatprep.subr.bf16.mxu0 %v2875_v37  ;;  %1638 = vmatprep.subr.bf16.mxu1 %v2920_v45  ;;  %v2950_v45 = vld [vmem:[#allocation8 + $0xcc] ss:$24 sps:$4 sm:$0xff]  }
  0x98   :  { %1596 = vmatpush1.bf16.msra.mxu0 %v2873_v38  ;;  %1639 = vmatpush1.bf16.msra.mxu1 %v2918_v47  ;;  %v2956_v47 = vld [vmem:[#allocation8 + $0x9c] ss:$24 sps:$4 sm:$0xff]  }
  0x99   :  { %1597 = vmatprep.subr.bf16.mxu0 %v2878_v39  ;;  %1640 = vmatprep.subr.bf16.mxu1 %v2926_v49  ;;  %v2962_v49 = vld [vmem:[#allocation8 + $0x6c] ss:$24 sps:$4 sm:$0xff]  }
  0x9c   :  { %1598 = vmatpush1.bf16.msra.mxu0 %v2876_v40  ;;  %1641 = vmatpush1.bf16.msra.mxu1 %v2924_v51  ;;  %v2930_v40 = vld [vmem:[#allocation8 + $0x158] ss:$24 sps:$4 sm:$0xff]   ;;  %v373_v51 = vsub.s32 3, %v3437_v16 }
  0x9d   :  { %1599 = vmatprep.subr.bf16.mxu0 %v2881_v41  ;;  %1642 = vmatprep.subr.bf16.mxu1 %v2929_v53  ;;  %v2938_v41 = vld [vmem:[#allocation8 + $0x12c] ss:$24 sps:$4 sm:$0xff]   ;;  %v2968_v53 = vld [vmem:[#allocation8 + $0x3c] ss:$24 sps:$4 sm:$0xff]  }
  0xa0   :  { %1600 = vmatpush2.bf16.msra.mxu0 %v2879_v42  ;;  %1643 = vmatpush2.bf16.msra.mxu1 %v2927_v55  ;;  %v2936_v42 = vld [vmem:[#allocation8 + $0x128] ss:$24 sps:$4 sm:$0xff]   ;;  %v374_v55 = vrot.slane %v357_v19, %v373_v51 }
  0xa1   :  { %1601 = vmatprep.subr.bf16.mxu0 %v2887_v43  ;;  %1644 = vmatprep.subr.bf16.mxu1 %v2935_v58  ;;  %v2944_v43 = vld [vmem:[#allocation8 + $0xfc] ss:$24 sps:$4 sm:$0xff]   ;;  %v2966_v58 = vld [vmem:[#allocation8 + $0x38] ss:$24 sps:$4 sm:$0xff]  }
  0xa4   :  { %1602 = vmatpush2.bf16.msra.mxu0 %v2885_v44  ;;  %1645 = vmatpush2.bf16.msra.mxu1 %v2933_v57  ;;  %v2942_v44 = vld [vmem:[#allocation8 + $0xf8] ss:$24 sps:$4 sm:$0xff]  }
  0xa5   :  { %1603 = vmatprep.subr.bf16.mxu0 %v2893_v46  ;;  %1646 = vmatprep.subr.bf16.mxu1 %v2941_v62  ;;  %v2948_v46 = vld [vmem:[#allocation8 + $0xc8] ss:$24 sps:$4 sm:$0xff]  }
  0xa8   :  { %1604 = vmatpush2.bf16.msra.mxu0 %v2891_v48  ;;  %1647 = vmatpush2.bf16.msra.mxu1 %v2939_v61  ;;  %v2954_v48 = vld [vmem:[#allocation8 + $0x98] ss:$24 sps:$4 sm:$0xff]   ;;  %v2974_v61 = vld [vmem:[#allocation8 + $0xc] ss:$24 sps:$4 sm:$0xff]  }
  0xa9   :  { %1605 = vmatprep.subr.bf16.mxu0 %v2899_v50  ;;  %1648 = vmatprep.subr.bf16.mxu1 %v2947_v2  ;;  %v369_v50 = vsub.s32 2, %v3437_v16 }
  0xac   :  { %1606 = vmatpush2.bf16.msra.mxu0 %v2897_v52  ;;  %1649 = vmatpush2.bf16.msra.mxu1 %v2945_v1  ;;  %v2960_v52 = vld [vmem:[#allocation8 + $0x68] ss:$24 sps:$4 sm:$0xff]  }
  0xad   :  { %1607 = vmatprep.subr.bf16.mxu0 %v2905_v54  ;;  %1650 = vmatprep.subr.bf16.mxu1 %v2953_v6  ;;  %v370_v54 = vrot.slane %v357_v19, %v369_v50  ;;  %v2983_v19 = vld [vmem:[#allocation8 + $0x2ac] ss:$24 sps:$4 sm:$0xff]  }
  0xb0   :  { %1608 = vmatpush2.bf16.msra.mxu0 %v2903_v56  ;;  %1651 = vmatpush2.bf16.msra.mxu1 %v2951_v5 }
  0xb1   :  { %1609 = vmatprep.subr.bf16.mxu0 %v2911_v59  ;;  %1652 = vmatprep.subr.bf16.mxu1 %v2959_v9 }
  0xb4   :  { %1610 = vmatpush2.bf16.msra.mxu0 %v2909_v60  ;;  %1653 = vmatpush2.bf16.msra.mxu1 %v2957_v8 }
  0xb5   :  { %1611 = vmatprep.subr.bf16.mxu0 %v2917_v63  ;;  %1654 = vmatprep.subr.bf16.mxu1 %v2965_v10 }
  0xb8   :  { %1612 = vmatpush2.bf16.msra.mxu0 %v2915_v0  ;;  %1655 = vmatpush2.bf16.msra.mxu1 %v2963_v11 }
  0xb9   :  { %1613 = vmatprep.subr.bf16.mxu0 %v2923_v3  ;;  %1656 = vmatprep.subr.bf16.mxu1 %v2971_v12 }
  0xbc   :  { %1614 = vmatpush2.bf16.msra.mxu0 %v2921_v4  ;;  %1657 = vmatpush2.bf16.msra.mxu1 %v2969_v13  ;;  %v2972_v4 = vld [vmem:[#allocation8 + $0x8] ss:$24 sps:$4 sm:$0xff]  }
  0xbd   :  { %1669 = vmatprep.subr.bf16.mxu0 %v2932_v7  ;;  %1712 = vmatprep.subr.bf16.mxu1 %v2980_v14  ;;  %v2977_v7 = vld [vmem:[#allocation8 + $0x2dc] ss:$24 sps:$4 sm:$0xff]   ;;  %v2975_v14 = vld [vmem:[#allocation8 + $0x2d8] ss:$24 sps:$4 sm:$0xff]  }
 0x11f   :  { %v200_v22 = vpop.f32.mrf.mxu0  ;;  %v250_v23 = vpop.f32.mrf.mxu1 }
 0x120   :  { %v379_v26 = vadd.f32 %v362_v20, %v200_v22  ;;  %v380_v27 = vadd.f32 %v366_v21, %v250_v23  ;;  %v2984_v22 = vld [vmem:[#allocation8 + $0x428] ss:$24 sps:$4 sm:$0xff]   ;;  %v2989_v23 = vld [vmem:[#allocation8 + $0x27c] ss:$24 sps:$4 sm:$0xff]  }
 0x121   :  { %v2767_v24 = vpop.f32.mrf.mxu0  ;;  %v2787_v25 = vpop.f32.mrf.mxu1 }
 0x122   :  { %v387_v34 = vmax.f32 %v379_v26, 0.0  ;;  %v388_v35 = vmax.f32 %v380_v27, 0.0  ;;  %v2992_v24 = vld [vmem:[#allocation8 + $0x3fc] ss:$24 sps:$4 sm:$0xff]   ;;  %v2987_v25 = vld [vmem:[#allocation8 + $0x278] ss:$24 sps:$4 sm:$0xff]  }
 0x123   :  { %v203_v28 = vpop.f32.mrf.mxu0  ;;  %v253_v29 = vpop.f32.mrf.mxu1  ;;  %v2990_v26 = vld [vmem:[#allocation8 + $0x3f8] ss:$24 sps:$4 sm:$0xff]   ;;  %v2995_v27 = vld [vmem:[#allocation8 + $0x24c] ss:$24 sps:$4 sm:$0xff]  }
 0x124   :  { %v383_v30 = vadd.f32 %v362_v20, %v203_v28  ;;  %v384_v31 = vadd.f32 %v366_v21, %v253_v29  ;;  %v2986_v20 = vld [vmem:[#allocation8 + $0x42c] ss:$24 sps:$4 sm:$0xff]   ;;  %v2981_v21 = vld [vmem:[#allocation8 + $0x2a8] ss:$24 sps:$4 sm:$0xff]  }
 0x125   :  { %v2768_v32 = vpop.f32.mrf.mxu0  ;;  %v2788_v33 = vpop.f32.mrf.mxu1  ;;  %v2998_v28 = vld [vmem:[#allocation8 + $0x3cc] ss:$24 sps:$4 sm:$0xff]   ;;  %v2993_v29 = vld [vmem:[#allocation8 + $0x248] ss:$24 sps:$4 sm:$0xff]  }
 0x126   :  { %v391_v36 = vmax.f32 %v383_v30, 0.0  ;;  %v392_v37 = vmax.f32 %v384_v31, 0.0  ;;  %v2996_v30 = vld [vmem:[#allocation8 + $0x3c8] ss:$24 sps:$4 sm:$0xff]   ;;  %v3001_v31 = vld [vmem:[#allocation8 + $0x21c] ss:$24 sps:$4 sm:$0xff]  }
 0x127   :  { %v3004_v32 = vld [vmem:[#allocation8 + $0x39c] ss:$24 sps:$4 sm:$0xff]   ;;  %v2999_v33 = vld [vmem:[#allocation8 + $0x218] ss:$24 sps:$4 sm:$0xff]  }
 0x128   :  { %v3445_v38 = vpack.c.bf16 %v391_v36, %v387_v34  ;;  %v3447_v39 = vpack.c.bf16 %v392_v37, %v388_v35  ;;  %v3002_v34 = vld [vmem:[#allocation8 + $0x398] ss:$24 sps:$4 sm:$0xff]   ;;  %v3007_v35 = vld [vmem:[#allocation8 + $0x1ec] ss:$24 sps:$4 sm:$0xff]   ;;  %v3005_v37 = vld [vmem:[#allocation8 + $0x1e8] ss:$24 sps:$4 sm:$0xff]  }
 0x129   :  { %v3010_v36 = vld [vmem:[#allocation8 + $0x36c] ss:$24 sps:$4 sm:$0xff]  }
 0x12a   :  { %1615 = vmatprep.mubr.bf16.mxu0 %v3447_v39 }
 0x12b   :  { %1616 = vmatmul.mubr.bf16.vlgmr.msra.gmra.mxu0 %v3445_v38 }
 0x12c   :  { %1670 = vmatpush1.bf16.msra.mxu0 %v2930_v40  ;;  %1701 = vmatprep.mubr.bf16.mxu0 %v3447_v39  ;;  %v3008_v40 = vld [vmem:[#allocation8 + $0x368] ss:$24 sps:$4 sm:$0xff]  }
 0x12d   :  { %1671 = vmatprep.subr.bf16.mxu0 %v2938_v41  ;;  %v3013_v41 = vld [vmem:[#allocation8 + $0x1bc] ss:$24 sps:$4 sm:$0xff]  }
 0x130   :  { %1672 = vmatpush1.bf16.msra.mxu0 %v2936_v42  ;;  %v3016_v42 = vld [vmem:[#allocation8 + $0x33c] ss:$24 sps:$4 sm:$0xff]  }
 0x131   :  { %1673 = vmatprep.subr.bf16.mxu0 %v2944_v43  ;;  %v3011_v43 = vld [vmem:[#allocation8 + $0x1b8] ss:$24 sps:$4 sm:$0xff]  }
 0x134   :  { %1674 = vmatpush1.bf16.msra.mxu0 %v2942_v44  ;;  %v3014_v44 = vld [vmem:[#allocation8 + $0x338] ss:$24 sps:$4 sm:$0xff]  }
 0x135   :  { %1675 = vmatprep.subr.bf16.mxu0 %v2950_v45  ;;  %v3019_v45 = vld [vmem:[#allocation8 + $0x18c] ss:$24 sps:$4 sm:$0xff]  }
 0x138   :  { %1676 = vmatpush1.bf16.msra.mxu0 %v2948_v46  ;;  %v3022_v46 = vld [vmem:[#allocation8 + $0x30c] ss:$24 sps:$4 sm:$0xff]  }
 0x139   :  { %1677 = vmatprep.subr.bf16.mxu0 %v2956_v47  ;;  %v3017_v47 = vld [vmem:[#allocation8 + $0x188] ss:$24 sps:$4 sm:$0xff]  }
 0x13c   :  { %1678 = vmatpush1.bf16.msra.mxu0 %v2954_v48  ;;  %v3020_v48 = vld [vmem:[#allocation8 + $0x308] ss:$24 sps:$4 sm:$0xff]  }
 0x13d   :  { %1679 = vmatprep.subr.bf16.mxu0 %v2962_v49  ;;  %v3025_v49 = vld [vmem:[#allocation8 + $0x5dc] ss:$24 sps:$4 sm:$0xff]  }
 0x13f   :  { %v300_v56 = vpop.f32.mrf.mxu0  ;;  %v350_v57 = vpop.f32.mrf.mxu1 }
 0x140   :  { %1680 = vmatpush1.bf16.msra.mxu0 %v2960_v52  ;;  %v381_v62 = vadd.f32 %v370_v54, %v300_v56  ;;  %v382_v63 = vadd.f32 %v374_v55, %v350_v57  ;;  %v3028_v52 = vld [vmem:[#allocation8 + $0x164] ss:$24 sps:$4 sm:$0xff]   ;;  %v3034_v56 = vld [vmem:[#allocation8 + $0x134] ss:$24 sps:$4 sm:$0xff]   ;;  %v3029_v57 = vld [vmem:[#allocation8 + $0x5a8] ss:$24 sps:$4 sm:$0xff]  }
 0x141   :  { %v2807_v59 = vpop.f32.mrf.mxu0  ;;  %v2827_v60 = vpop.f32.mrf.mxu1  ;;  %1681 = vmatprep.subr.bf16.mxu0 %v2968_v53  ;;  %v3023_v53 = vld [vmem:[#allocation8 + $0x5d8] ss:$24 sps:$4 sm:$0xff]  }
 0x142   :  { %v389_v8 = vmax.f32 %v381_v62, 0.0  ;;  %v390_v9 = vmax.f32 %v382_v63, 0.0  ;;  %v3037_v59 = vld [vmem:[#allocation8 + $0x57c] ss:$24 sps:$4 sm:$0xff]   ;;  %v3038_v62 = vld [vmem:[#allocation8 + $0x100] ss:$24 sps:$4 sm:$0xff]  }
 0x143   :  { %v303_v0 = vpop.f32.mrf.mxu0  ;;  %v353_v1 = vpop.f32.mrf.mxu1  ;;  %v3040_v60 = vld [vmem:[#allocation8 + $0x104] ss:$24 sps:$4 sm:$0xff]  }
 0x144   :  { %v385_v2 = vadd.f32 %v370_v54, %v303_v0  ;;  %v386_v3 = vadd.f32 %v374_v55, %v353_v1  ;;  %1682 = vmatpush1.bf16.msra.mxu0 %v2966_v58  ;;  %v3026_v54 = vld [vmem:[#allocation8 + $0x160] ss:$24 sps:$4 sm:$0xff]   ;;  %v3031_v55 = vld [vmem:[#allocation8 + $0x5ac] ss:$24 sps:$4 sm:$0xff]   ;;  %v3032_v58 = vld [vmem:[#allocation8 + $0x130] ss:$24 sps:$4 sm:$0xff]  }
 0x145   :  { %v2808_v5 = vpop.f32.mrf.mxu0  ;;  %v2828_v6 = vpop.f32.mrf.mxu1  ;;  %1683 = vmatprep.subr.bf16.mxu0 %v2974_v61  ;;  %v3035_v61 = vld [vmem:[#allocation8 + $0x578] ss:$24 sps:$4 sm:$0xff]   ;;  %v3043_v63 = vld [vmem:[#allocation8 + $0x54c] ss:$24 sps:$4 sm:$0xff]   ;;  %v3041_v1 = vld [vmem:[#allocation8 + $0x548] ss:$24 sps:$4 sm:$0xff]  }
 0x146   :  { %v393_v10 = vmax.f32 %v385_v2, 0.0  ;;  %v394_v11 = vmax.f32 %v386_v3, 0.0  ;;  %v3046_v0 = vld [vmem:[#allocation8 + $0xd4] ss:$24 sps:$4 sm:$0xff]   ;;  %v3044_v2 = vld [vmem:[#allocation8 + $0xd0] ss:$24 sps:$4 sm:$0xff]  }
 0x147   :  { %v3049_v3 = vld [vmem:[#allocation8 + $0x51c] ss:$24 sps:$4 sm:$0xff]   ;;  %v3050_v5 = vld [vmem:[#allocation8 + $0xa0] ss:$24 sps:$4 sm:$0xff]   ;;  %v3055_v6 = vld [vmem:[#allocation8 + $0x4ec] ss:$24 sps:$4 sm:$0xff]  }
 0x148   :  { %v3458_v12 = vpack.c.bf16 %v393_v10, %v389_v8  ;;  %v3460_v13 = vpack.c.bf16 %v394_v11, %v390_v9  ;;  %1684 = vmatpush1.bf16.msra.mxu0 %v2972_v4  ;;  %v3047_v4 = vld [vmem:[#allocation8 + $0x518] ss:$24 sps:$4 sm:$0xff]   ;;  %v3053_v8 = vld [vmem:[#allocation8 + $0x4e8] ss:$24 sps:$4 sm:$0xff]   ;;  %v3061_v10 = vld [vmem:[#allocation8 + $0x4bc] ss:$24 sps:$4 sm:$0xff]  }
 0x149   :  { %1685 = vmatprep.subr.bf16.mxu0 %v2977_v7  ;;  %v3058_v7 = vld [vmem:[#allocation8 + $0x74] ss:$24 sps:$4 sm:$0xff]   ;;  %v3056_v9 = vld [vmem:[#allocation8 + $0x70] ss:$24 sps:$4 sm:$0xff]   ;;  %v3064_v11 = vld [vmem:[#allocation8 + $0x44] ss:$24 sps:$4 sm:$0xff]  }
 0x14a   :  { %1658 = vmatprep.mubr.bf16.mxu1 %v3460_v13 }
 0x14b   :  { %1659 = vmatmul.mubr.bf16.vlgmr.msra.gmra.mxu1 %v3458_v12 }
 0x14c   :  { %1686 = vmatpush2.bf16.msra.mxu0 %v2975_v14  ;;  %1713 = vmatpush1.bf16.msra.mxu1 %v2978_v15  ;;  %v3059_v14 = vld [vmem:[#allocation8 + $0x4b8] ss:$24 sps:$4 sm:$0xff]  }
 0x14d   :  { %1744 = vmatprep.mubr.bf16.mxu1 %v3460_v13  ;;  %1687 = vmatprep.subr.bf16.mxu0 %v2983_v19  ;;  %v3062_v15 = vld [vmem:[#allocation8 + $0x40] ss:$24 sps:$4 sm:$0xff]   ;;  %v3067_v19 = vld [vmem:[#allocation8 + $0x48c] ss:$24 sps:$4 sm:$0xff]  }
 0x14e   :  { %1714 = vmatprep.subr.bf16.mxu1 %v2986_v20  ;;  %v3070_v20 = vld [vmem:[#allocation8 + $0x14] ss:$24 sps:$4 sm:$0xff]  }
 0x150   :  { %1688 = vmatpush2.bf16.msra.mxu0 %v2981_v21  ;;  %1715 = vmatpush1.bf16.msra.mxu1 %v2984_v22  ;;  %v3065_v21 = vld [vmem:[#allocation8 + $0x488] ss:$24 sps:$4 sm:$0xff]  }
 0x151   :  { %1689 = vmatprep.subr.bf16.mxu0 %v2989_v23  ;;  %1716 = vmatprep.subr.bf16.mxu1 %v2992_v24  ;;  %v3068_v22 = vld [vmem:[#allocation8 + $0x10] ss:$24 sps:$4 sm:$0xff]   ;;  %v3073_v23 = vld [vmem:[#allocation8 + $0x2e4] ss:$24 sps:$4 sm:$0xff]  }
 0x152   :  { %v3076_v24 = vld [vmem:[#allocation8 + $0x464] ss:$24 sps:$4 sm:$0xff]  }
 0x154   :  { %1690 = vmatpush2.bf16.msra.mxu0 %v2987_v25  ;;  %1717 = vmatpush1.bf16.msra.mxu1 %v2990_v26  ;;  %v3071_v25 = vld [vmem:[#allocation8 + $0x2e0] ss:$24 sps:$4 sm:$0xff]  }
 0x155   :  { %1691 = vmatprep.subr.bf16.mxu0 %v2995_v27  ;;  %1718 = vmatprep.subr.bf16.mxu1 %v2998_v28  ;;  %v3074_v26 = vld [vmem:[#allocation8 + $0x460] ss:$24 sps:$4 sm:$0xff]   ;;  %v3079_v27 = vld [vmem:[#allocation8 + $0x2b4] ss:$24 sps:$4 sm:$0xff]  }
 0x156   :  { %v3082_v28 = vld [vmem:[#allocation8 + $0x434] ss:$24 sps:$4 sm:$0xff]  }
 0x158   :  { %1692 = vmatpush2.bf16.msra.mxu0 %v2993_v29  ;;  %1719 = vmatpush1.bf16.msra.mxu1 %v2996_v30  ;;  %v3077_v29 = vld [vmem:[#allocation8 + $0x2b0] ss:$24 sps:$4 sm:$0xff]  }
 0x159   :  { %1693 = vmatprep.subr.bf16.mxu0 %v3001_v31  ;;  %1720 = vmatprep.subr.bf16.mxu1 %v3004_v32  ;;  %v3080_v30 = vld [vmem:[#allocation8 + $0x430] ss:$24 sps:$4 sm:$0xff]   ;;  %v3085_v31 = vld [vmem:[#allocation8 + $0x284] ss:$24 sps:$4 sm:$0xff]  }
 0x15a   :  { %v3088_v32 = vld [vmem:[#allocation8 + $0x404] ss:$24 sps:$4 sm:$0xff]  }
 0x15c   :  { %1694 = vmatpush2.bf16.msra.mxu0 %v2999_v33  ;;  %1721 = vmatpush1.bf16.msra.mxu1 %v3002_v34  ;;  %v3083_v33 = vld [vmem:[#allocation8 + $0x280] ss:$24 sps:$4 sm:$0xff]  }
 0x15d   :  { %1695 = vmatprep.subr.bf16.mxu0 %v3007_v35  ;;  %1722 = vmatprep.subr.bf16.mxu1 %v3010_v36  ;;  %v3086_v34 = vld [vmem:[#allocation8 + $0x400] ss:$24 sps:$4 sm:$0xff]   ;;  %v3091_v35 = vld [vmem:[#allocation8 + $0x254] ss:$24 sps:$4 sm:$0xff]  }
 0x15e   :  { %v3094_v36 = vld [vmem:[#allocation8 + $0x3d4] ss:$24 sps:$4 sm:$0xff]  }
 0x160   :  { %1696 = vmatpush2.bf16.msra.mxu0 %v3005_v37  ;;  %1723 = vmatpush1.bf16.msra.mxu1 %v3008_v40  ;;  %v3089_v37 = vld [vmem:[#allocation8 + $0x250] ss:$24 sps:$4 sm:$0xff]  }
 0x161   :  { %1697 = vmatprep.subr.bf16.mxu0 %v3013_v41  ;;  %1724 = vmatprep.subr.bf16.mxu1 %v3016_v42  ;;  %v3092_v40 = vld [vmem:[#allocation8 + $0x3d0] ss:$24 sps:$4 sm:$0xff]   ;;  %v3097_v41 = vld [vmem:[#allocation8 + $0x224] ss:$24 sps:$4 sm:$0xff]   ;;  %v3095_v42 = vld [vmem:[#allocation8 + $0x220] ss:$24 sps:$4 sm:$0xff]  }
 0x164   :  { %1698 = vmatpush2.bf16.msra.mxu0 %v3011_v43  ;;  %1725 = vmatpush1.bf16.msra.mxu1 %v3014_v44  ;;  %v3098_v43 = vld [vmem:[#allocation8 + $0x3a0] ss:$24 sps:$4 sm:$0xff]   ;;  %v3103_v44 = vld [vmem:[#allocation8 + $0x1f4] ss:$24 sps:$4 sm:$0xff]  }
 0x165   :  { %1699 = vmatprep.subr.bf16.mxu0 %v3019_v45  ;;  %1726 = vmatprep.subr.bf16.mxu1 %v3022_v46  ;;  %v3106_v45 = vld [vmem:[#allocation8 + $0x374] ss:$24 sps:$4 sm:$0xff]   ;;  %v3101_v46 = vld [vmem:[#allocation8 + $0x1f0] ss:$24 sps:$4 sm:$0xff]  }
 0x168   :  { %1700 = vmatpush2.bf16.msra.mxu0 %v3017_v47  ;;  %1727 = vmatpush1.bf16.msra.mxu1 %v3020_v48  ;;  %v3104_v47 = vld [vmem:[#allocation8 + $0x370] ss:$24 sps:$4 sm:$0xff]   ;;  %v3109_v48 = vld [vmem:[#allocation8 + $0x1c4] ss:$24 sps:$4 sm:$0xff]  }
 0x169   :  { %1728 = vmatprep.subr.bf16.mxu1 %v3025_v49  ;;  %1755 = vmatprep.subr.bf16.mxu0 %v3028_v52  ;;  %v3112_v49 = vld [vmem:[#allocation8 + $0x344] ss:$24 sps:$4 sm:$0xff]   ;;  %v3107_v52 = vld [vmem:[#allocation8 + $0x1c0] ss:$24 sps:$4 sm:$0xff]  }
 0x16b   :  { %1702 = vmatmul.mubr.bf16.vlgmr.msra.gmra.mxu0 %v3445_v38 }
 0x16c   :  { %1729 = vmatpush2.bf16.msra.mxu1 %v3023_v53  ;;  %1756 = vmatpush1.bf16.msra.mxu0 %v3026_v54  ;;  %v3110_v53 = vld [vmem:[#allocation8 + $0x340] ss:$24 sps:$4 sm:$0xff]   ;;  %v3115_v54 = vld [vmem:[#allocation8 + $0x194] ss:$24 sps:$4 sm:$0xff]  }
 0x16d   :  { %1787 = vmatprep.mubr.bf16.mxu0 %v3447_v39  ;;  %1730 = vmatprep.subr.bf16.mxu1 %v3031_v55  ;;  %v3052_v39 = vld [vmem:[#allocation8 + $0xa4] ss:$24 sps:$4 sm:$0xff]   ;;  %v3118_v55 = vld [vmem:[#allocation8 + $0x314] ss:$24 sps:$4 sm:$0xff]  }
 0x16e   :  { %1757 = vmatprep.subr.bf16.mxu0 %v3034_v56  ;;  %v3113_v56 = vld [vmem:[#allocation8 + $0x190] ss:$24 sps:$4 sm:$0xff]  }
 0x170   :  { %1731 = vmatpush2.bf16.msra.mxu1 %v3029_v57  ;;  %1758 = vmatpush1.bf16.msra.mxu0 %v3032_v58  ;;  %v3116_v57 = vld [vmem:[#allocation8 + $0x310] ss:$24 sps:$4 sm:$0xff]   ;;  %v3121_v58 = vld [vmem:[#allocation8 + $0x5e4] ss:$24 sps:$4 sm:$0xff]  }
 0x171   :  { %1732 = vmatprep.subr.bf16.mxu1 %v3037_v59  ;;  %1759 = vmatprep.subr.bf16.mxu0 %v3040_v60  ;;  %v3143_v59 = vld [vmem:[#allocation10 + $0x78] sm:$0xff]  }
 0x172   :  { %v3119_v60 = vld [vmem:[#allocation8 + $0x5e0] ss:$24 sps:$4 sm:$0xff]  }
 0x174   :  { %1733 = vmatpush2.bf16.msra.mxu1 %v3035_v61  ;;  %1760 = vmatpush1.bf16.msra.mxu0 %v3038_v62  ;;  %v3144_v61 = vld [vmem:[#allocation10 + $0x38] sm:$0xff]   ;;  %v3124_v62 = vld [vmem:[#allocation8 + $0x5b4] ss:$24 sps:$4 sm:$0xff]  }
 0x175   :  { %1734 = vmatprep.subr.bf16.mxu1 %v3043_v63  ;;  %1761 = vmatprep.subr.bf16.mxu0 %v3046_v0  ;;  %v3145_v63 = vld [vmem:[#allocation10 + $0x70] sm:$0xff]  }
 0x176   :  { %v3122_v0 = vld [vmem:[#allocation8 + $0x5b0] ss:$24 sps:$4 sm:$0xff]  }
 0x178   :  { %1735 = vmatpush2.bf16.msra.mxu1 %v3041_v1  ;;  %1762 = vmatpush1.bf16.msra.mxu0 %v3044_v2  ;;  %v3146_v1 = vld [vmem:[#allocation10 + $0x30] sm:$0xff]   ;;  %v3127_v2 = vld [vmem:[#allocation8 + $0x584] ss:$24 sps:$4 sm:$0xff]  }
 0x179   :  { %1736 = vmatprep.subr.bf16.mxu1 %v3049_v3  ;;  %1763 = vmatprep.subr.bf16.mxu0 %v3052_v39  ;;  %v3147_v3 = vld [vmem:[#allocation10 + $0x68] sm:$0xff]   ;;  %v3125_v39 = vld [vmem:[#allocation8 + $0x580] ss:$24 sps:$4 sm:$0xff]  }
 0x17c   :  { %1737 = vmatpush2.bf16.msra.mxu1 %v3047_v4  ;;  %1764 = vmatpush1.bf16.msra.mxu0 %v3050_v5  ;;  %v3148_v4 = vld [vmem:[#allocation10 + $0x28] sm:$0xff]  }
 0x17d   :  { %1738 = vmatprep.subr.bf16.mxu1 %v3055_v6  ;;  %1765 = vmatprep.subr.bf16.mxu0 %v3058_v7  ;;  %v3130_v5 = vld [vmem:[#allocation8 + $0x554] ss:$24 sps:$4 sm:$0xff]   ;;  %v3149_v6 = vld [vmem:[#allocation10 + $0x60] sm:$0xff]   ;;  %v3128_v7 = vld [vmem:[#allocation8 + $0x550] ss:$24 sps:$4 sm:$0xff]  }
 0x180   :  { %1739 = vmatpush2.bf16.msra.mxu1 %v3053_v8  ;;  %1766 = vmatpush1.bf16.msra.mxu0 %v3056_v9  ;;  %v3133_v8 = vld [vmem:[#allocation8 + $0x524] ss:$24 sps:$4 sm:$0xff]  }
 0x181   :  { %1740 = vmatprep.subr.bf16.mxu1 %v3061_v10  ;;  %1767 = vmatprep.subr.bf16.mxu0 %v3064_v11  ;;  %v3151_v9 = vld [vmem:[#allocation10 + $0x58] sm:$0xff]  }
 0x182   :  { %v3131_v10 = vld [vmem:[#allocation8 + $0x520] ss:$24 sps:$4 sm:$0xff]  }
 0x183   :  { %v3152_v11 = vld [vmem:[#allocation10 + $0x18] sm:$0xff]  }
 0x184   :  { %1741 = vmatpush2.bf16.msra.mxu1 %v3059_v14  ;;  %1768 = vmatpush1.bf16.msra.mxu0 %v3062_v15  ;;  %v3136_v14 = vld [vmem:[#allocation8 + $0x4f4] ss:$24 sps:$4 sm:$0xff]  }
 0x185   :  { %1742 = vmatprep.subr.bf16.mxu1 %v3067_v19  ;;  %1769 = vmatprep.subr.bf16.mxu0 %v3070_v20  ;;  %v3153_v15 = vld [vmem:[#allocation10 + $0x50] sm:$0xff]  }
 0x186   :  { %v3134_v19 = vld [vmem:[#allocation8 + $0x4f0] ss:$24 sps:$4 sm:$0xff]  }
 0x187   :  { %v3154_v20 = vld [vmem:[#allocation10 + $0x10] sm:$0xff]  }
 0x188   :  { %1743 = vmatpush2.bf16.msra.mxu1 %v3065_v21  ;;  %1770 = vmatpush1.bf16.msra.mxu0 %v3068_v22  ;;  %v3139_v21 = vld [vmem:[#allocation8 + $0x4c4] ss:$24 sps:$4 sm:$0xff]   ;;  %v3155_v22 = vld [vmem:[#allocation10 + $0x48] sm:$0xff]  }
 0x189   :  { %1771 = vmatprep.subr.bf16.mxu0 %v3073_v23  ;;  %1798 = vmatprep.subr.bf16.mxu1 %v3076_v24  ;;  %v3137_v23 = vld [vmem:[#allocation8 + $0x4c0] ss:$24 sps:$4 sm:$0xff]   ;;  %v3156_v24 = vld [vmem:[#allocation10 + $0x8] sm:$0xff]  }
 0x18b   :  { %1745 = vmatmul.mubr.bf16.vlgmr.msra.gmra.mxu1 %v3458_v12 }
 0x18c   :  { %1772 = vmatpush2.bf16.msra.mxu0 %v3071_v25  ;;  %1799 = vmatpush1.bf16.msra.mxu1 %v3074_v26  ;;  %v3142_v25 = vld [vmem:[#allocation8 + $0x494] ss:$24 sps:$4 sm:$0xff]   ;;  %v3157_v26 = vld [vmem:[#allocation10 + $0x40] sm:$0xff]  }
 0x18d   :  { %1830 = vmatprep.mubr.bf16.mxu1 %v3460_v13  ;;  %1773 = vmatprep.subr.bf16.mxu0 %v3079_v27  ;;  %v3100_v13 = vld [vmem:[#allocation8 + $0x3a4] ss:$24 sps:$4 sm:$0xff]   ;;  %v3140_v27 = vld [vmem:[#allocation8 + $0x490] ss:$24 sps:$4 sm:$0xff]  }
 0x18e   :  { %1800 = vmatprep.subr.bf16.mxu1 %v3082_v28  ;;  %v3158_v28 = vld [vmem:[#allocation10] sm:$0xff]  }
 0x190   :  { %1774 = vmatpush2.bf16.msra.mxu0 %v3077_v29  ;;  %1801 = vmatpush1.bf16.msra.mxu1 %v3080_v30  ;;  %v3159_v29 = vld [vmem:[#allocation10 + $0xf8] sm:$0xff]  }
 0x191   :  { %1775 = vmatprep.subr.bf16.mxu0 %v3085_v31  ;;  %1802 = vmatprep.subr.bf16.mxu1 %v3088_v32  ;;  %v3160_v30 = vld [vmem:[#allocation10 + $0xb8] sm:$0xff]   ;;  %v3161_v31 = vld [vmem:[#allocation10 + $0xf0] sm:$0xff]  }
 0x192   :  { %v3162_v32 = vld [vmem:[#allocation10 + $0xb0] sm:$0xff]  }
 0x194   :  { %1776 = vmatpush2.bf16.msra.mxu0 %v3083_v33  ;;  %1803 = vmatpush1.bf16.msra.mxu1 %v3086_v34  ;;  %v3163_v33 = vld [vmem:[#allocation10 + $0xe8] sm:$0xff]  }
 0x195   :  { %1777 = vmatprep.subr.bf16.mxu0 %v3091_v35  ;;  %1804 = vmatprep.subr.bf16.mxu1 %v3094_v36  ;;  %v3164_v34 = vld [vmem:[#allocation10 + $0xa8] sm:$0xff]   ;;  %v3165_v35 = vld [vmem:[#allocation10 + $0xe0] sm:$0xff]  }
 0x196   :  { %v3166_v36 = vld [vmem:[#allocation10 + $0xa0] sm:$0xff]  }
 0x198   :  { %1778 = vmatpush2.bf16.msra.mxu0 %v3089_v37  ;;  %1805 = vmatpush1.bf16.msra.mxu1 %v3092_v40  ;;  %v3167_v37 = vld [vmem:[#allocation10 + $0xd8] sm:$0xff]  }
 0x199   :  { %1779 = vmatprep.subr.bf16.mxu0 %v3097_v41  ;;  %1806 = vmatprep.subr.bf16.mxu1 %v3100_v13  ;;  %v3168_v40 = vld [vmem:[#allocation10 + $0x98] sm:$0xff]   ;;  %v3169_v41 = vld [vmem:[#allocation10 + $0xd0] sm:$0xff]  }
 0x19a   :  { %v3170_v13 = vld [vmem:[#allocation10 + $0x90] sm:$0xff]  }
 0x19c   :  { %1780 = vmatpush2.bf16.msra.mxu0 %v3095_v42  ;;  %1807 = vmatpush1.bf16.msra.mxu1 %v3098_v43  ;;  %v3172_v42 = vld [vmem:[#allocation10 + $0x88] sm:$0xff]   ;;  %v3173_v43 = vld [vmem:[#allocation10 + $0xc0] sm:$0xff]  }
 0x19d   :  { %1781 = vmatprep.subr.bf16.mxu0 %v3103_v44  ;;  %1808 = vmatprep.subr.bf16.mxu1 %v3106_v45  ;;  %v3174_v44 = vld [vmem:[#allocation10 + $0x80] sm:$0xff]   ;;  %v3175_v45 = vld [vmem:[#allocation10 + $0x178] sm:$0xff]  }
 0x1a0   :  { %1782 = vmatpush2.bf16.msra.mxu0 %v3101_v46  ;;  %1809 = vmatpush1.bf16.msra.mxu1 %v3104_v47 }
 0x1a1   :  { %1783 = vmatprep.subr.bf16.mxu0 %v3109_v48  ;;  %1810 = vmatprep.subr.bf16.mxu1 %v3112_v49  ;;  %v3474_v48 = vld [vmem:[%s3502_s4] sm:$0x3f] }
 0x1a4   :  { %1784 = vmatpush2.bf16.msra.mxu0 %v3107_v52  ;;  %1811 = vmatpush1.bf16.msra.mxu1 %v3110_v53  ;;  %v600_v52 = vrot.slane %v3474_v48, %v365_v18  ;;  %v596_v53 = vrot.slane %v3474_v48, %v361_v17 }
 0x1a5   :  { %1785 = vmatprep.subr.bf16.mxu0 %v3115_v54  ;;  %1812 = vmatprep.subr.bf16.mxu1 %v3118_v55 }
 0x1a8   :  { %1786 = vmatpush2.bf16.msra.mxu0 %v3113_v56  ;;  %1813 = vmatpush1.bf16.msra.mxu1 %v3116_v57 }
 0x1a9   :  { %1814 = vmatprep.subr.bf16.mxu1 %v3121_v58  ;;  %2683 = vmatprep.subr.bf16.mxu0 %v3143_v59 }
 0x1ab   :  { %1788 = vmatmul.mubr.bf16.vlgmr.msra.gmra.mxu0 %v3445_v38  ;;  %v3150_v38 = vld [vmem:[#allocation10 + $0x20] sm:$0xff]  }
 0x1ac   :  { %1815 = vmatpush2.bf16.msra.mxu1 %v3119_v60  ;;  %2684 = vmatpush3.bf16.msra.mxu0 %v3144_v61 }
 0x1ad   :  { %1816 = vmatprep.subr.bf16.mxu1 %v3124_v62  ;;  %2685 = vmatprep.subr.bf16.mxu0 %v3145_v63 }
 0x1b0   :  { %1817 = vmatpush2.bf16.msra.mxu1 %v3122_v0  ;;  %2686 = vmatpush3.bf16.msra.mxu0 %v3146_v1 }
 0x1b1   :  { %1818 = vmatprep.subr.bf16.mxu1 %v3127_v2  ;;  %2687 = vmatprep.subr.bf16.mxu0 %v3147_v3 }
 0x1b4   :  { %1819 = vmatpush2.bf16.msra.mxu1 %v3125_v39  ;;  %2688 = vmatpush3.bf16.msra.mxu0 %v3148_v4 }
 0x1b5   :  { %1820 = vmatprep.subr.bf16.mxu1 %v3130_v5  ;;  %2689 = vmatprep.subr.bf16.mxu0 %v3149_v6  ;;  %v3176_v6 = vld [vmem:[#allocation10 + $0x138] sm:$0xff]  }
 0x1b8   :  { %1821 = vmatpush2.bf16.msra.mxu1 %v3128_v7  ;;  %2690 = vmatpush3.bf16.msra.mxu0 %v3150_v38  ;;  %v3177_v7 = vld [vmem:[#allocation10 + $0x170] sm:$0xff]  }
 0x1b9   :  { %1822 = vmatprep.subr.bf16.mxu1 %v3133_v8  ;;  %2691 = vmatprep.subr.bf16.mxu0 %v3151_v9  ;;  %v3178_v38 = vld [vmem:[#allocation10 + $0x130] sm:$0xff]   ;;  %v3179_v8 = vld [vmem:[#allocation10 + $0x168] sm:$0xff]  }
 0x1ba   :  { %v3180_v9 = vld [vmem:[#allocation10 + $0x128] sm:$0xff]  }
 0x1bc   :  { %1823 = vmatpush2.bf16.msra.mxu1 %v3131_v10  ;;  %2692 = vmatpush3.bf16.msra.mxu0 %v3152_v11  ;;  %v3181_v10 = vld [vmem:[#allocation10 + $0x160] sm:$0xff]  }
 0x1bd   :  { %1824 = vmatprep.subr.bf16.mxu1 %v3136_v14  ;;  %2693 = vmatprep.subr.bf16.mxu0 %v3153_v15  ;;  %v3182_v11 = vld [vmem:[#allocation10 + $0x120] sm:$0xff]   ;;  %v3183_v14 = vld [vmem:[#allocation10 + $0x158] sm:$0xff]  }
 0x1be   :  { %v3184_v15 = vld [vmem:[#allocation10 + $0x118] sm:$0xff]  }
 0x1c0   :  { %1825 = vmatpush2.bf16.msra.mxu1 %v3134_v19  ;;  %2694 = vmatpush3.bf16.msra.mxu0 %v3154_v20  ;;  %v3185_v19 = vld [vmem:[#allocation10 + $0x150] sm:$0xff]  }
 0x1c1   :  { %1826 = vmatprep.subr.bf16.mxu1 %v3139_v21  ;;  %2695 = vmatprep.subr.bf16.mxu0 %v3155_v22  ;;  %v3186_v20 = vld [vmem:[#allocation10 + $0x110] sm:$0xff]   ;;  %v3187_v21 = vld [vmem:[#allocation10 + $0x148] sm:$0xff]  }
 0x1c2   :  { %v3188_v22 = vld [vmem:[#allocation10 + $0x108] sm:$0xff]  }
 0x1c4   :  { %1827 = vmatpush2.bf16.msra.mxu1 %v3137_v23  ;;  %2696 = vmatpush3.bf16.msra.mxu0 %v3156_v24  ;;  %v3189_v23 = vld [vmem:[#allocation10 + $0x140] sm:$0xff]  }
 0x1c5   :  { %1828 = vmatprep.subr.bf16.mxu1 %v3142_v25  ;;  %2697 = vmatprep.subr.bf16.mxu0 %v3157_v26  ;;  %v3190_v24 = vld [vmem:[#allocation10 + $0x100] sm:$0xff]  }
 0x1c8   :  { %1829 = vmatpush2.bf16.msra.mxu1 %v3140_v27  ;;  %2698 = vmatpush3.bf16.msra.mxu0 %v3158_v28  ;;  %v608_v28 = vrot.slane %v3474_v48, %v373_v51 }
 0x1c9   :  { %2705 = vmatprep.subr.bf16.mxu1 %v3159_v29  ;;  %2727 = vmatprep.subr.bf16.mxu0 %v3175_v45  ;;  %v604_v29 = vrot.slane %v3474_v48, %v369_v50 }
 0x1cb   :  { %1831 = vmatmul.mubr.bf16.vlgmr.msra.gmra.mxu1 %v3458_v12  ;;  %v3171_v12 = vld [vmem:[#allocation10 + $0xc8] sm:$0xff]  }
 0x1cc   :  { %2706 = vmatpush3.bf16.msra.mxu1 %v3160_v30 }
 0x1cd   :  { %2707 = vmatprep.subr.bf16.mxu1 %v3161_v31 }
 0x1d0   :  { %2708 = vmatpush3.bf16.msra.mxu1 %v3162_v32 }
 0x1d1   :  { %2709 = vmatprep.subr.bf16.mxu1 %v3163_v33 }
 0x1d4   :  { %2710 = vmatpush3.bf16.msra.mxu1 %v3164_v34 }
 0x1d5   :  { %2711 = vmatprep.subr.bf16.mxu1 %v3165_v35 }
 0x1d8   :  { %2712 = vmatpush3.bf16.msra.mxu1 %v3166_v36 }
 0x1d9   :  { %2713 = vmatprep.subr.bf16.mxu1 %v3167_v37 }
 0x1dc   :  { %2714 = vmatpush3.bf16.msra.mxu1 %v3168_v40 }
 0x1dd   :  { %2715 = vmatprep.subr.bf16.mxu1 %v3169_v41 }
 0x1e0   :  { %2716 = vmatpush3.bf16.msra.mxu1 %v3170_v13 }
 0x1e1   :  { %2717 = vmatprep.subr.bf16.mxu1 %v3171_v12 }
 0x1e4   :  { %2718 = vmatpush3.bf16.msra.mxu1 %v3172_v42 }
 0x1e5   :  { %2719 = vmatprep.subr.bf16.mxu1 %v3173_v43 }
 0x1e8   :  { %2720 = vmatpush3.bf16.msra.mxu1 %v3174_v44 }
 0x1eb   :  { %v1617_v46 = vpop.f32.mrf.mxu0 }
 0x1ec   :  { %v1618_v59 = vadd.f32 %v1617_v46, %v596_v53 }
 0x1ed   :  { %v1619_v47 = vpop.f32.mrf.mxu0 }
 0x1ee   :  { %v1620_v57 = vadd.f32 %v1619_v47, %v600_v52 }
 0x1ef   :  { %v1621_v49 = vpop.f32.mrf.mxu0 }
 0x1f0   :  { %v1622_v58 = vadd.f32 %v1621_v49, %v596_v53  ;;  %v611_v53 = vsub.s32 4, %v3437_v16 }
 0x1f1   :  { %v1623_v55 = vpop.f32.mrf.mxu0 }
 0x1f2   :  { %v1624_v61 = vadd.f32 %v1623_v55, %v600_v52  ;;  %v615_v52 = vsub.s32 5, %v3437_v16 }
 0x1f4   :  { %v616_v55 = vrot.slane %v3474_v48, %v615_v52 }
 0x20b   :  { %v1660_v54 = vpop.f32.mrf.mxu1 }
 0x20c   :  { %v1661_v0 = vadd.f32 %v1660_v54, %v1618_v59 }
 0x20d   :  { %v1662_v56 = vpop.f32.mrf.mxu1 }
 0x20e   :  { %v1663_v62 = vadd.f32 %v1662_v56, %v1620_v57  ;;  %v1841_v4 = vmax.f32 %v1661_v0, 0.0  ;;  %v612_v56 = vrot.slane %v3474_v48, %v611_v53 }
 0x20f   :  { %v1664_v60 = vpop.f32.mrf.mxu1 }
 0x210   :  { %v1665_v63 = vadd.f32 %v1664_v60, %v1622_v58  ;;  %v1842_v39 = vmax.f32 %v1663_v62, 0.0 }
 0x211   :  { %v1666_v1 = vpop.f32.mrf.mxu1 }
 0x212   :  { %v1667_v2 = vadd.f32 %v1666_v1, %v1624_v61  ;;  %v1847_v3 = vmax.f32 %v1665_v63, 0.0 }
 0x214   :  { %v1848_v18 = vmax.f32 %v1667_v2, 0.0  ;;  %v1853_v17 = vpack.c.bf16 %v1847_v3, %v1841_v4 }
 0x216   :  { %v1854_v5 = vpack.c.bf16 %v1848_v18, %v1842_v39 }
 0x218   :  { %2282 = vmatprep.mubr.bf16.mxu0 %v1854_v5 }
 0x219   :  { %2283 = vmatmul.mubr.bf16.vlgmr.msra.gmra.mxu0 %v1853_v17 }
 0x21a   :  { %2728 = vmatpush3.bf16.msra.mxu0 %v3176_v6 }
 0x21b   :  { %2729 = vmatprep.subr.bf16.mxu0 %v3177_v7 }
 0x21e   :  { %2730 = vmatpush3.bf16.msra.mxu0 %v3178_v38 }
 0x21f   :  { %2731 = vmatprep.subr.bf16.mxu0 %v3179_v8 }
 0x222   :  { %2732 = vmatpush3.bf16.msra.mxu0 %v3180_v9 }
 0x223   :  { %2733 = vmatprep.subr.bf16.mxu0 %v3181_v10 }
 0x226   :  { %2734 = vmatpush3.bf16.msra.mxu0 %v3182_v11 }
 0x227   :  { %2735 = vmatprep.subr.bf16.mxu0 %v3183_v14 }
 0x22a   :  { %2736 = vmatpush3.bf16.msra.mxu0 %v3184_v15  ;;  %v2598_v15 = vld [vmem:[%s3504_s6] ss:$0 sm:$0xff]  ;;  %s3291_s6 = scalar_lea.vmem %s2381_s29, 256 }
 0x22b   :  { %2737 = vmatprep.subr.bf16.mxu0 %v3185_v19  ;;  %v1703_v25 = vpop.f32.mrf.mxu0  ;;  %p3292_p11 = scmp.ne.s32.totalorder %s2381_s29, %s3291_s6  ;;  %p3297_p13 = scmp.lt.s32.totalorder %s3291_s6, %s3291_s6 }
 0x22c   :  { %v1704_v35 = vadd.f32 %v1703_v25, %v604_v29 }
 0x22d   :  { %v1705_v26 = vpop.f32.mrf.mxu0  ;;  %p3298_p0 = por %p3297_p13, %p3296_p12 }
 0x22e   :  { %2738 = vmatpush3.bf16.msra.mxu0 %v3186_v20  ;;  %v1706_v33 = vadd.f32 %v1705_v26, %v608_v28 }
 0x22f   :  { %2739 = vmatprep.subr.bf16.mxu0 %v3187_v21  ;;  %v1707_v27 = vpop.f32.mrf.mxu0  ;;  %p3299_p1 = pnand %p3298_p0, %p3292_p11 }
 0x230   :  { %v1708_v34 = vadd.f32 %v1707_v27, %v604_v29 }
 0x231   :  { %v1709_v31 = vpop.f32.mrf.mxu0 }
 0x232   :  { %2740 = vmatpush3.bf16.msra.mxu0 %v3188_v22  ;;  %v1710_v37 = vadd.f32 %v1709_v31, %v608_v28 }
 0x233   :  { %2741 = vmatprep.subr.bf16.mxu0 %v3189_v23 }
 0x236   :  { %2742 = vmatpush3.bf16.msra.mxu0 %v3190_v24 }
 0x24b   :  { %v1746_v30 = vpop.f32.mrf.mxu1 }
 0x24c   :  { %v1747_v13 = vadd.f32 %v1746_v30, %v1704_v35 }
 0x24d   :  { %v1748_v32 = vpop.f32.mrf.mxu1 }
 0x24e   :  { %v1749_v40 = vadd.f32 %v1748_v32, %v1706_v33  ;;  %v1843_v45 = vmax.f32 %v1747_v13, 0.0 }
 0x24f   :  { %v1750_v36 = vpop.f32.mrf.mxu1 }
 0x250   :  { %v1751_v41 = vadd.f32 %v1750_v36, %v1708_v34  ;;  %v1844_v44 = vmax.f32 %v1749_v40, 0.0 }
 0x251   :  { %v1752_v12 = vpop.f32.mrf.mxu1 }
 0x252   :  { %v1753_v42 = vadd.f32 %v1752_v12, %v1710_v37  ;;  %v1849_v43 = vmax.f32 %v1751_v41, 0.0 }
 0x254   :  { %v1850_v51 = vmax.f32 %v1753_v42, 0.0  ;;  %v1855_v47 = vpack.c.bf16 %v1849_v43, %v1843_v45 }
 0x256   :  { %v1856_v46 = vpack.c.bf16 %v1850_v51, %v1844_v44 }
 0x258   :  { %2323 = vmatprep.mubr.bf16.mxu1 %v1856_v46 }
 0x259   :  { %2324 = vmatmul.mubr.bf16.vlgmr.msra.gmra.mxu1 %v1855_v47 }
 0x26b   :  { %v1789_v50 = vpop.f32.mrf.mxu0 }
 0x26c   :  { %v1790_v62 = vadd.f32 %v1789_v50, %v612_v56 }
 0x26d   :  { %v1791_v49 = vpop.f32.mrf.mxu0 }
 0x26e   :  { %v1792_v60 = vadd.f32 %v1791_v49, %v616_v55 }
 0x26f   :  { %v1793_v54 = vpop.f32.mrf.mxu0 }
 0x270   :  { %v1794_v61 = vadd.f32 %v1793_v54, %v612_v56 }
 0x271   :  { %v1795_v58 = vpop.f32.mrf.mxu0 }
 0x272   :  { %v1796_v0 = vadd.f32 %v1795_v58, %v616_v55 }
 0x28b   :  { %v1832_v57 = vpop.f32.mrf.mxu1 }
 0x28c   :  { %v1833_v3 = vadd.f32 %v1832_v57, %v1790_v62 }
 0x28d   :  { %v1834_v59 = vpop.f32.mrf.mxu1 }
 0x28e   :  { %v1835_v1 = vadd.f32 %v1834_v59, %v1792_v60  ;;  %v1845_v6 = vmax.f32 %v1833_v3, 0.0 }
 0x28f   :  { %v1836_v63 = vpop.f32.mrf.mxu1 }
 0x290   :  { %v1837_v2 = vadd.f32 %v1836_v63, %v1794_v61  ;;  %v1846_v16 = vmax.f32 %v1835_v1, 0.0 }
 0x291   :  { %v1838_v39 = vpop.f32.mrf.mxu1 }
 0x292   :  { %v1839_v18 = vadd.f32 %v1838_v39, %v1796_v0  ;;  %v1851_v4 = vmax.f32 %v1837_v2, 0.0 }
 0x294   :  { %v1852_v5 = vmax.f32 %v1839_v18, 0.0  ;;  %v1857_v7 = vpack.c.bf16 %v1851_v4, %v1845_v6 }
 0x296   :  { %v1858_v17 = vpack.c.bf16 %v1852_v5, %v1846_v16 }
 0x298   :  { %2364 = vmatprep.mubr.bf16.mxu0 %v1858_v17 }
 0x299   :  { %2365 = vmatmul.mubr.bf16.vlgmr.msra.gmra.mxu0 %v1857_v7 }
 0x2d9   :  { %v2699_v48 = vpop.f32.mrf.mxu0 }
 0x2db   :  { %v2700_v8 = vpop.f32.mrf.mxu0 }
 0x2dc   :  { %v2701_v14 = vadd.f32 %v2700_v8, %v2699_v48 }
 0x2dd   :  { %v2702_v10 = vpop.f32.mrf.mxu0 }
 0x2de   :  { %v2285_v23 = vadd.f32 %v2701_v14, %v2598_v15 }
 0x2df   :  { %v2703_v19 = vpop.f32.mrf.mxu0 }
 0x2e0   :  { %v2704_v24 = vadd.f32 %v2703_v19, %v2702_v10 }
 0x2e2   :  { %v2288_v30 = vadd.f32 %v2704_v24, %v2598_v15 }
 0x319   :  { %v2721_v38 = vpop.f32.mrf.mxu1 }
 0x31b   :  { %v2722_v9 = vpop.f32.mrf.mxu1 }
 0x31c   :  { %v2723_v20 = vadd.f32 %v2722_v9, %v2721_v38 }
 0x31d   :  { %v2724_v11 = vpop.f32.mrf.mxu1 }
 0x31e   :  { %v2326_v26 = vadd.f32 %v2723_v20, %v2285_v23 }
 0x31f   :  { %v2725_v21 = vpop.f32.mrf.mxu1 }
 0x320   :  { %v2726_v27 = vadd.f32 %v2725_v21, %v2724_v11 }
 0x322   :  { %v2329_v33 = vadd.f32 %v2726_v27, %v2288_v30 }
 0x359   :  { %v2743_v22 = vpop.f32.mrf.mxu0 }
 0x35b   :  { %v2744_v25 = vpop.f32.mrf.mxu0 }
 0x35c   :  { %v2745_v28 = vadd.f32 %v2744_v25, %v2743_v22 }
 0x35d   :  { %v2746_v29 = vpop.f32.mrf.mxu0 }
 0x35e   :  { %v2367_v31 = vadd.f32 %v2745_v28, %v2326_v26 }
 0x35f   :  { %v2747_v32 = vpop.f32.mrf.mxu0 }
 0x360   :  { %2373 = vst [vmem:[#allocation11] sm:$0xff] %v2367_v31  ;;  %v2748_v34 = vadd.f32 %v2747_v32, %v2746_v29 }
 0x362   :  { %v2370_v35 = vadd.f32 %v2748_v34, %v2329_v33 }
 0x364   :  { %2374 = vst [vmem:[#allocation11 + $0x8] sm:$0xff] %v2370_v35 }
 0x365   :  { %3302 = shalt.err (!%p3299_p1)
}
 0x366   :  { %s3331_s30 = smov 128   ;;  %s3332_s8 = smov 8  }
 0x367   :  { %2386 = dma.vmem_to_hbm [thread:$0]  %s2381_s29, 256, %s3505_s7, [#allocation4], %s3331_s30, %s3331_s30, %s3332_s8  }
 0x368   :  { %3317 = dma.done.wait [#allocation4], 256  }
 0x369   :  { %3318 = vsyncadd [#allocation4], 4294967040 }
 0x36a   :  { %2390 = vsyncpa [#allocation3], 1 }
 0x36b   :  { %2391 = vsyncpa [#allocation6], 1 }
 0x36c   :  { %2392 = vsyncpa [#allocation9], 1 }
 0x36d   :  { %2393 = vsyncpa [#allocation4], 1 }

</bundles_post_ra>
